<compile_context>
chip_gen: v5e
topology: v5e:2x2
jax: 0.10.0
libtpu: 0.0.40
codegen_flags: <defaults>
</compile_context>

<pallas_src>
import functools
import math

import jax
import jax.numpy as jnp
from jax.experimental import pallas as pl
from jax.experimental.pallas import tpu as pltpu


# ---------------------------------------------------------------------------
# VMEM budget (generation aware)
# ---------------------------------------------------------------------------
def _vmem_limit_bytes():
    cap = 64 << 20  # conservative default = v7x physical VMEM
    try:
        cap = int(pltpu.get_tpu_info().vmem_capacity_bytes)
    except Exception:
        pass
    # Leave headroom under the physical capacity; never ask for more than 100MiB.
    return max(32 << 20, min(cap - (16 << 20), 100 << 20))


def _pick_lane_tile(L, C, n_batch, vmem_limit):
    """Largest lane tile TL (multiple of 128 dividing L, or L itself) whose
    (C, TL) f32 block stays well inside VMEM once double-buffered for both the
    input and the output, preferring >= 8 total grid steps for DMA overlap."""
    per_block_budget = max(128 * 1024, min(4 << 20, vmem_limit // 8))
    cands = [d for d in range(128, L + 1, 128) if L % d == 0]
    if not cands:
        # TODO(synk): pad L to a multiple of 128 instead of a full-row block.
        cands = [L]
    cands = sorted(cands, reverse=True)
    fitting = [t for t in cands if C * t * 4 <= per_block_budget] or [cands[-1]]
    for t in fitting:  # largest tile that still yields >= 8 grid steps
        if n_batch * (L // t) >= 8:
            return t
    return fitting[-1]  # small input: maximize step count instead


# ---------------------------------------------------------------------------
# Path A: fully fused, VMEM-resident kernel (stats + normalize + conv + mul)
# ---------------------------------------------------------------------------
def _sa_fused_resident_kernel(x_ref, gamma_ref, beta_ref, w_ref, b_ref, o_ref,
                              *, eps, inv_count):
    x = x_ref[...]                                             # (N, C, L) f32
    # Per-channel batch mean and TRUE two-pass variance (no cancellation).
    s = jnp.sum(x, axis=2, keepdims=True)                      # (N, C, 1)
    mean = jnp.sum(s, axis=0, keepdims=True) * inv_count       # (1, C, 1)
    xc = x - mean                                              # (N, C, L)
    sq = jnp.sum(xc * xc, axis=2, keepdims=True)               # (N, C, 1)
    var = jnp.sum(sq, axis=0, keepdims=True) * inv_count       # (1, C, 1)
    inv_std = jax.lax.rsqrt(var + eps)[0]                      # (C, 1)
    scale = gamma_ref[...] * inv_std                           # (C, 1)
    shift = beta_ref[...]                                      # (C, 1)
    w = w_ref[...]                                             # (1, C)
    b = b_ref[0]                                               # SMEM scalar
    for n in range(x.shape[0]):                                # static unroll
        xn = xc[n] * scale + shift                             # (C, L)
        logit = jnp.dot(w, xn, preferred_element_type=jnp.float32)  # MXU (1, L)
        att = jax.nn.sigmoid(logit + b)                        # (1, L)
        o_ref[n] = (xn * att).astype(o_ref.dtype)


def _fused_resident(x3, gamma_col, beta_col, w_row, b1, *, eps, vmem_limit):
    N, C, L = x3.shape
    kernel = functools.partial(
        _sa_fused_resident_kernel, eps=float(eps), inv_count=1.0 / float(N * L))
    vmem = pl.BlockSpec(memory_space=pltpu.MemorySpace.VMEM)
    smem = pl.BlockSpec(memory_space=pltpu.MemorySpace.SMEM)
    return pl.pallas_call(
        kernel,
        out_shape=jax.ShapeDtypeStruct((N, C, L), jnp.float32),
        in_specs=[vmem, vmem, vmem, vmem, smem],
        out_specs=vmem,
        compiler_params=pltpu.CompilerParams(vmem_limit_bytes=int(vmem_limit)),
    )(x3, gamma_col, beta_col, w_row, b1)


# ---------------------------------------------------------------------------
# Path B (large inputs): tiled stats pass + fused apply pass, NCHW-native
# ---------------------------------------------------------------------------
def _bn_stats_kernel(x_ref, sum_ref, sq_ref):
    n = pl.program_id(1)
    r = pl.program_id(2)

    @pl.when((n == 0) & (r == 0))
    def _():
        sum_ref[...] = jnp.zeros_like(sum_ref)
        sq_ref[...] = jnp.zeros_like(sq_ref)

    xb = x_ref[...]                                            # (C, TL)
    sum_ref[...] += jnp.sum(xb, axis=-1, keepdims=True)        # (C, 1)
    sq_ref[...] += jnp.sum(xb * xb, axis=-1, keepdims=True)


def _bn_stats_two_pass(x3, vmem_limit):
    """x3: (N, C, L) f32 -> (mean, biased var), each (C,) f32."""
    N, C, L = x3.shape
    tl = _pick_lane_tile(L, C, N, vmem_limit)
    n_lt = L // tl
    P = 2 if (n_lt % 2 == 0 and n_lt >= 2) else 1   # core split (helps v7x)
    R = n_lt // P
    sums, sqs = pl.pallas_call(
        _bn_stats_kernel,
        out_shape=(jax.ShapeDtypeStruct((P, C, 1), jnp.float32),
                   jax.ShapeDtypeStruct((P, C, 1), jnp.float32)),
        grid=(P, N, R),
        in_specs=[pl.BlockSpec((None, C, tl), lambda p, n, r: (n, 0, p * R + r))],
        out_specs=[pl.BlockSpec((None, C, 1), lambda p, n, r: (p, 0, 0)),
                   pl.BlockSpec((None, C, 1), lambda p, n, r: (p, 0, 0))],
        compiler_params=pltpu.CompilerParams(
            dimension_semantics=("parallel", "arbitrary", "arbitrary"),
            vmem_limit_bytes=int(vmem_limit)),
    )(x3)
    count = float(N * L)
    total = jnp.sum(sums[:, :, 0], axis=0)                     # (C,)
    total_sq = jnp.sum(sqs[:, :, 0], axis=0)                   # (C,)
    mean = total / count
    # TODO(synk): E[x^2]-E[x]^2 can lose precision when |mean| >> std; the
    # VMEM-resident path uses a true two-pass variance instead.
    var = jnp.maximum(total_sq / count - mean * mean, 0.0)
    return mean, var


def _sa_apply_kernel(x_ref, scale_ref, shift_ref, w_ref, b_ref, o_ref):
    xn = x_ref[...] * scale_ref[...] + shift_ref[...]          # (C, TL)
    logit = jnp.dot(w_ref[...], xn, preferred_element_type=jnp.float32)  # MXU (1, TL)
    att = jax.nn.sigmoid(logit + b_ref[0])                     # (1, TL)
    o_ref[...] = (xn * att).astype(o_ref.dtype)


def _apply_two_pass(x3, scale_col, shift_col, w_row, b1, vmem_limit):
    N, C, L = x3.shape
    tl = _pick_lane_tile(L, C, N, vmem_limit)
    n_lt = L // tl
    return pl.pallas_call(
        _sa_apply_kernel,
        out_shape=jax.ShapeDtypeStruct((N, C, L), jnp.float32),
        grid=(N, n_lt),
        in_specs=[
            pl.BlockSpec((None, C, tl), lambda n, l: (n, 0, l)),
            pl.BlockSpec((C, 1), lambda n, l: (0, 0)),
            pl.BlockSpec((C, 1), lambda n, l: (0, 0)),
            pl.BlockSpec((1, C), lambda n, l: (0, 0)),
            pl.BlockSpec(memory_space=pltpu.MemorySpace.SMEM),
        ],
        out_specs=pl.BlockSpec((None, C, tl), lambda n, l: (n, 0, l)),
        compiler_params=pltpu.CompilerParams(
            dimension_semantics=("parallel", "parallel"),
            vmem_limit_bytes=int(vmem_limit)),
    )(x3, scale_col, shift_col, w_row, b1)


# ---------------------------------------------------------------------------
# Forward wrapper
# ---------------------------------------------------------------------------
def spatial_attention_forward(x_nchw, params, eps=1e-5, force_two_pass=False):
    """Forward pass of SpatialAttention. x_nchw: (N, C, H, W) float32."""
    conv_w = params["conv_w"]   # (1, C, 1, 1) torch layout
    conv_b = params["conv_b"]   # (1,)
    gamma = params["gamma"]     # (C,)
    beta = params["beta"]       # (C,)

    N, C, H, W = x_nchw.shape
    L = H * W
    x3 = x_nchw.reshape(N, C, L).astype(jnp.float32)           # free reshape
    w_row = conv_w.reshape(1, C).astype(jnp.float32)
    b1 = conv_b.reshape(1).astype(jnp.float32)                  # SMEM scalar
    gamma_col = gamma.reshape(C, 1).astype(jnp.float32)
    beta_col = beta.reshape(C, 1).astype(jnp.float32)

    vmem_limit = _vmem_limit_bytes()
    x_bytes = N * C * L * 4
    resident = (not force_two_pass) and (6 * x_bytes + (1 << 20) <= vmem_limit)

    if resident:
        out3 = _fused_resident(x3, gamma_col, beta_col, w_row, b1,
                               eps=eps, vmem_limit=vmem_limit)
    else:
        mean, var = _bn_stats_two_pass(x3, vmem_limit)
        scale = gamma_col[:, 0] / jnp.sqrt(var + eps)            # (C,)
        shift = beta_col[:, 0] - mean * scale                    # (C,)
        out3 = _apply_two_pass(x3, scale.reshape(C, 1), shift.reshape(C, 1),
                               w_row, b1, vmem_limit)

    return out3.reshape(N, C, H, W)                              # free reshape


# ---------------------------------------------------------------------------
# Deterministic parameters mirroring PyTorch defaults
# ---------------------------------------------------------------------------
def make_params(in_channels, seed=0):
    kw, kb = jax.random.split(jax.random.PRNGKey(seed + 1), 2)
    bound = 1.0 / math.sqrt(in_channels)  # Conv2d default init bound (fan_in = C)
    return {
        "conv_w": jax.random.uniform(
            kw, (1, in_channels, 1, 1), jnp.float32, -bound, bound),
        "conv_b": jax.random.uniform(kb, (1,), jnp.float32, -bound, bound),
        "gamma": jnp.ones((in_channels,), jnp.float32),
        "beta": jnp.zeros((in_channels,), jnp.float32),
    }


def _reference_forward(x, params, eps=1e-5):
    """Plain-JAX reference (training-mode BN, biased batch statistics)."""
    C = x.shape[1]
    mean = x.mean(axis=(0, 2, 3), keepdims=True)
    var = x.var(axis=(0, 2, 3), keepdims=True)
    xn = params["gamma"].reshape(1, C, 1, 1) * (x - mean) / jnp.sqrt(var + eps) \
        + params["beta"].reshape(1, C, 1, 1)
    logit = (xn * params["conv_w"].reshape(1, C, 1, 1)).sum(axis=1, keepdims=True) \
        + params["conv_b"][0]
    return xn * jax.nn.sigmoid(logit)


if __name__ == "__main__":
    # SpatialAttention(128) as instantiated inside HyperSpectraNet.
    N, C, H, W = 2, 128, 16, 16
    x = jax.random.normal(jax.random.PRNGKey(0), (N, C, H, W), jnp.float32)
    params = make_params(C)

    # Path A: fully fused, VMEM-resident kernel.
    fwd = jax.jit(spatial_attention_forward)
    out = jax.block_until_ready(fwd(x, params))
    ref = _reference_forward(x, params)
    assert out.shape == (N, C, H, W)
    assert bool(jnp.all(jnp.isfinite(out)))
    assert bool(jnp.allclose(out, ref, atol=1e-3, rtol=1e-3))

    # Path B: exercise the tiled stats + apply fallback on a larger input.
    H2, W2 = 32, 32
    x2 = jax.random.normal(jax.random.PRNGKey(2), (N, C, H2, W2), jnp.float32)
    fwd2 = jax.jit(functools.partial(spatial_attention_forward, force_two_pass=True))
    out2 = jax.block_until_ready(fwd2(x2, params))
    ref2 = _reference_forward(x2, params)
    assert out2.shape == (N, C, H2, W2)
    assert bool(jnp.all(jnp.isfinite(out2)))
    assert bool(jnp.allclose(out2, ref2, atol=1e-3, rtol=1e-3))

    print("KERNEL_OK")
</pallas_src>

<mosaic_0001>
module attributes {stable_mosaic.version = 11 : i64} {
  func.func @_sa_fused_resident_kernel(%arg0: memref<2x128x256xf32, #tpu.memory_space<vmem>>, %arg1: memref<128x1xf32, #tpu.memory_space<vmem>>, %arg2: memref<128x1xf32, #tpu.memory_space<vmem>>, %arg3: memref<1x128xf32, #tpu.memory_space<vmem>>, %arg4: memref<1xf32, #tpu.memory_space<smem>>, %arg5: memref<2x128x256xf32, #tpu.memory_space<vmem>>) attributes {dimension_semantics = [], scalar_prefetch = 0 : i64, scratch_operands = 0 : i64, tpu.core_type = #tpu.core_type<tc>} {
    %c0 = arith.constant 0 : index
    %c0_0 = arith.constant 0 : index
    %c0_1 = arith.constant 0 : index
    %0 = vector.load %arg0[%c0, %c0_0, %c0_1] : memref<2x128x256xf32, #tpu.memory_space<vmem>>, vector<2x128x256xf32>
    %cst = arith.constant dense<0.000000e+00> : vector<2x128xf32>
    %1 = vector.multi_reduction <add>, %0, %cst [2] : vector<2x128x256xf32> to vector<2x128xf32>
    %2 = vector.shape_cast %1 : vector<2x128xf32> to vector<2x128x1xf32>
    %cst_2 = arith.constant dense<0.000000e+00> : vector<128x1xf32>
    %3 = vector.multi_reduction <add>, %2, %cst_2 [0] : vector<2x128x1xf32> to vector<128x1xf32>
    %4 = vector.shape_cast %3 : vector<128x1xf32> to vector<1x128x1xf32>
    %cst_3 = arith.constant 0.001953125 : f32
    %5 = vector.broadcast %cst_3 : f32 to vector<1x128x1xf32>
    %6 = arith.mulf %4, %5 : vector<1x128x1xf32>
    %7 = vector.broadcast %6 : vector<1x128x1xf32> to vector<2x128x256xf32>
    %8 = arith.subf %0, %7 : vector<2x128x256xf32>
    %9 = arith.mulf %8, %8 : vector<2x128x256xf32>
    %cst_4 = arith.constant dense<0.000000e+00> : vector<2x128xf32>
    %10 = vector.multi_reduction <add>, %9, %cst_4 [2] : vector<2x128x256xf32> to vector<2x128xf32>
    %11 = vector.shape_cast %10 : vector<2x128xf32> to vector<2x128x1xf32>
    %cst_5 = arith.constant dense<0.000000e+00> : vector<128x1xf32>
    %12 = vector.multi_reduction <add>, %11, %cst_5 [0] : vector<2x128x1xf32> to vector<128x1xf32>
    %13 = vector.shape_cast %12 : vector<128x1xf32> to vector<1x128x1xf32>
    %cst_6 = arith.constant 0.001953125 : f32
    %14 = vector.broadcast %cst_6 : f32 to vector<1x128x1xf32>
    %15 = arith.mulf %13, %14 : vector<1x128x1xf32>
    %cst_7 = arith.constant 9.99999974E-6 : f32
    %16 = vector.broadcast %cst_7 : f32 to vector<1x128x1xf32>
    %17 = arith.addf %15, %16 : vector<1x128x1xf32>
    %18 = math.rsqrt %17 : vector<1x128x1xf32>
    %19 = vector.shape_cast %18 : vector<1x128x1xf32> to vector<128x1xf32>
    %c0_8 = arith.constant 0 : index
    %c0_9 = arith.constant 0 : index
    %20 = vector.load %arg1[%c0_8, %c0_9] : memref<128x1xf32, #tpu.memory_space<vmem>>, vector<128x1xf32>
    %21 = arith.mulf %20, %19 : vector<128x1xf32>
    %c0_10 = arith.constant 0 : index
    %c0_11 = arith.constant 0 : index
    %22 = vector.load %arg2[%c0_10, %c0_11] : memref<128x1xf32, #tpu.memory_space<vmem>>, vector<128x1xf32>
    %c0_12 = arith.constant 0 : index
    %c0_13 = arith.constant 0 : index
    %23 = vector.load %arg3[%c0_12, %c0_13] : memref<1x128xf32, #tpu.memory_space<vmem>>, vector<1x128xf32>
    %c0_14 = arith.constant 0 : index
    %24 = memref.load %arg4[%c0_14] : memref<1xf32, #tpu.memory_space<smem>>
    %25 = vector.extract_strided_slice %8 {offsets = [0, 0, 0], sizes = [1, 128, 256], strides = [1, 1, 1]} : vector<2x128x256xf32> to vector<1x128x256xf32>
    %26 = vector.shape_cast %25 : vector<1x128x256xf32> to vector<128x256xf32>
    %27 = vector.broadcast %21 : vector<128x1xf32> to vector<128x256xf32>
    %28 = arith.mulf %26, %27 : vector<128x256xf32>
    %29 = vector.broadcast %22 : vector<128x1xf32> to vector<128x256xf32>
    %30 = arith.addf %28, %29 : vector<128x256xf32>
    %cst_15 = arith.constant dense<0.000000e+00> : vector<1x256xf32>
    %31 = tpu.matmul %23, %30, %cst_15 {dimension_numbers = #tpu.dot_dimension_numbers<[1], [0], [0], [1], [0, 0, 1, 1], [], []>} : vector<1x128xf32>, vector<128x256xf32>, vector<1x256xf32> -> vector<1x256xf32>
    %32 = vector.broadcast %24 : f32 to vector<1x256xf32>
    %33 = arith.addf %31, %32 : vector<1x256xf32>
    %34 = arith.negf %33 : vector<1x256xf32>
    %35 = math.exp %34 : vector<1x256xf32>
    %cst_16 = arith.constant 1.000000e+00 : f32
    %36 = vector.broadcast %cst_16 : f32 to vector<1x256xf32>
    %37 = arith.addf %36, %35 : vector<1x256xf32>
    %38 = arith.divf %36, %37 : vector<1x256xf32>
    %39 = vector.broadcast %38 : vector<1x256xf32> to vector<128x256xf32>
    %40 = arith.mulf %30, %39 : vector<128x256xf32>
    %c0_17 = arith.constant 0 : index
    %c0_18 = arith.constant 0 : index
    %c0_19 = arith.constant 0 : index
    %41 = vector.load %arg5[%c0_17, %c0_18, %c0_19] : memref<2x128x256xf32, #tpu.memory_space<vmem>>, vector<1x128x256xf32>
    %42 = vector.shape_cast %41 : vector<1x128x256xf32> to vector<128x256xf32>
    %43 = vector.shape_cast %40 : vector<128x256xf32> to vector<1x128x256xf32>
    tpu.vector_store %arg5[%c0_17, %c0_18, %c0_19], %43 {strides = array<i32>} : memref<2x128x256xf32, #tpu.memory_space<vmem>>, vector<1x128x256xf32>,
    %44 = vector.extract_strided_slice %8 {offsets = [1, 0, 0], sizes = [1, 128, 256], strides = [1, 1, 1]} : vector<2x128x256xf32> to vector<1x128x256xf32>
    %45 = vector.shape_cast %44 : vector<1x128x256xf32> to vector<128x256xf32>
    %46 = vector.broadcast %21 : vector<128x1xf32> to vector<128x256xf32>
    %47 = arith.mulf %45, %46 : vector<128x256xf32>
    %48 = vector.broadcast %22 : vector<128x1xf32> to vector<128x256xf32>
    %49 = arith.addf %47, %48 : vector<128x256xf32>
    %cst_20 = arith.constant dense<0.000000e+00> : vector<1x256xf32>
    %50 = tpu.matmul %23, %49, %cst_20 {dimension_numbers = #tpu.dot_dimension_numbers<[1], [0], [0], [1], [0, 0, 1, 1], [], []>} : vector<1x128xf32>, vector<128x256xf32>, vector<1x256xf32> -> vector<1x256xf32>
    %51 = vector.broadcast %24 : f32 to vector<1x256xf32>
    %52 = arith.addf %50, %51 : vector<1x256xf32>
    %53 = arith.negf %52 : vector<1x256xf32>
    %54 = math.exp %53 : vector<1x256xf32>
    %cst_21 = arith.constant 1.000000e+00 : f32
    %55 = vector.broadcast %cst_21 : f32 to vector<1x256xf32>
    %56 = arith.addf %55, %54 : vector<1x256xf32>
    %57 = arith.divf %55, %56 : vector<1x256xf32>
    %58 = vector.broadcast %57 : vector<1x256xf32> to vector<128x256xf32>
    %59 = arith.mulf %49, %58 : vector<128x256xf32>
    %c1 = arith.constant 1 : index
    %c0_22 = arith.constant 0 : index
    %c0_23 = arith.constant 0 : index
    %60 = vector.load %arg5[%c1, %c0_22, %c0_23] : memref<2x128x256xf32, #tpu.memory_space<vmem>>, vector<1x128x256xf32>
    %61 = vector.shape_cast %60 : vector<1x128x256xf32> to vector<128x256xf32>
    %62 = vector.shape_cast %59 : vector<128x256xf32> to vector<1x128x256xf32>
    tpu.vector_store %arg5[%c1, %c0_22, %c0_23], %62 {strides = array<i32>} : memref<2x128x256xf32, #tpu.memory_space<vmem>>, vector<1x128x256xf32>,
    return
  }
}

</mosaic_0001>

<bundles_post_ra>
// kernel: spatial_attention_forward.1
= control target key start
LH: loop header
LB: loop body
LE: loop exit
PB: predicated region body
PF: predicated region fallthrough
CT: control target
= control target key end

     0   :  { %s2934_s0 = inlined_call_operand.vmem [shape: f32[2,128,256], index: 0, kind: input, shape index: {}]   ;;  %s2935_s2 = inlined_call_operand.vmem [shape: f32[128,1], index: 2, kind: input, shape index: {}]   ;;  %s2936_s1 = inlined_call_operand.vmem [shape: f32[128,1], index: 1, kind: input, shape index: {}]   ;;  %s2937_s3 = inlined_call_operand.vmem [shape: f32[1,128], index: 3, kind: input, shape index: {}]   ;;  %s2938_s4 = inlined_call_operand.<no memory space> [shape: f32[1], index: 4, kind: input, shape index: {}]   ;;  %s2939_s5 = inlined_call_operand.vmem [shape: f32[2,128,256], index: 5, kind: output, shape index: {}]  }
   0x1   :  { %v1399_v0 = vld [vmem:[%s2934_s0 + $0x40] sm:$0xff]  ;;  %v1404_v1 = vld [vmem:[%s2934_s0 + $0x48] sm:$0xff]  ;;  %v1435_v9 = vld [vmem:[%s2934_s0 + $0x50] sm:$0xff] }
   0x2   :  { %3017 = vst [vmem:[#allocation3_spill] sm:$0xff] %v1399_v0  ;;  %v1409_v2 = vld [vmem:[%s2934_s0 + $0x20] sm:$0xff]  ;;  %v97_v3 = vadd.f32 %v1404_v1, %v1399_v0  ;;  %v1416_v4 = vld [vmem:[%s2934_s0 + $0x28] sm:$0xff]  ;;  %v1440_v10 = vld [vmem:[%s2934_s0 + $0x58] sm:$0xff] }
   0x3   :  { %3018 = vst [vmem:[#allocation4_spill] sm:$0xff] %v1404_v1  ;;  %v1421_v5 = vld [vmem:[%s2934_s0] sm:$0xff]  ;;  %v1426_v6 = vld [vmem:[%s2934_s0 + $0x8] sm:$0xff]  ;;  %v91_v7 = vadd.f32 %v1416_v4, %v1409_v2  ;;  %v1445_v11 = vld [vmem:[%s2934_s0 + $0x30] sm:$0xff]  ;;  %v100_v15 = vadd.f32 %v1440_v10, %v1435_v9 }
   0x4   :  { %3019 = vst [vmem:[#allocation5_spill] sm:$0xff] %v1409_v2  ;;  %v85_v8 = vadd.f32 %v1426_v6, %v1421_v5  ;;  %98 = vadd.xlane.f32.xlu2 %v97_v3  ;;  %v1450_v12 = vld [vmem:[%s2934_s0 + $0x38] sm:$0xff]  ;;  %v1455_v13 = vld [vmem:[%s2934_s0 + $0x10] sm:$0xff]  ;;  %v1471_v18 = vld [vmem:[%s2934_s0 + $0x80] sm:$0xff] }
   0x5   :  { %3020 = vst [vmem:[#allocation6_spill] sm:$0xff] %v1416_v4  ;;  %92 = vadd.xlane.f32.xlu1 %v91_v7  ;;  %v1460_v14 = vld [vmem:[%s2934_s0 + $0x18] sm:$0xff]  ;;  %v94_v16 = vadd.f32 %v1450_v12, %v1445_v11  ;;  %v1476_v19 = vld [vmem:[%s2934_s0 + $0x88] sm:$0xff]  ;;  %v1481_v20 = vld [vmem:[%s2934_s0 + $0x70] sm:$0xff] }
   0x6   :  { %3021 = vst [vmem:[#allocation7_spill] sm:$0xff] %v1421_v5  ;;  %86 = vadd.xlane.f32.xlu0 %v85_v8  ;;  %v88_v17 = vadd.f32 %v1460_v14, %v1455_v13  ;;  %v1486_v21 = vld [vmem:[%s2934_s0 + $0x78] sm:$0xff]  ;;  %v1491_v22 = vld [vmem:[%s2934_s0 + $0x60] sm:$0xff]  ;;  %v1496_v23 = vld [vmem:[%s2934_s0 + $0x68] sm:$0xff]  ;;  %v109_v24 = vadd.f32 %v1476_v19, %v1471_v18 }
   0x7   :  { %3022 = vst [vmem:[#allocation8_spill] sm:$0xff] %v1426_v6  ;;  %v106_v25 = vadd.f32 %v1486_v21, %v1481_v20  ;;  %v103_v26 = vadd.f32 %v1496_v23, %v1491_v22  ;;  %v1507_v27 = vld [vmem:[%s2934_s0 + $0xb0] sm:$0xff]  ;;  %v1512_v28 = vld [vmem:[%s2934_s0 + $0xb8] sm:$0xff]  ;;  %v1517_v29 = vld [vmem:[%s2934_s0 + $0xa0] sm:$0xff] }
   0x8   :  { %3023 = vst [vmem:[#allocation9_spill] sm:$0xff] %v1435_v9  ;;  %v1522_v30 = vld [vmem:[%s2934_s0 + $0xa8] sm:$0xff]  ;;  %v1527_v31 = vld [vmem:[%s2934_s0 + $0x90] sm:$0xff]  ;;  %v1532_v32 = vld [vmem:[%s2934_s0 + $0x98] sm:$0xff]  ;;  %v118_v33 = vadd.f32 %v1512_v28, %v1507_v27 }
   0x9   :  { %3024 = vst [vmem:[#allocation10_spill] sm:$0xff] %v1440_v10  ;;  %v115_v34 = vadd.f32 %v1522_v30, %v1517_v29  ;;  %v112_v35 = vadd.f32 %v1532_v32, %v1527_v31  ;;  %v1543_v36 = vld [vmem:[%s2934_s0 + $0xe0] sm:$0xff]  ;;  %v1548_v37 = vld [vmem:[%s2934_s0 + $0xe8] sm:$0xff]  ;;  %v1553_v38 = vld [vmem:[%s2934_s0 + $0x1f0] sm:$0xff] }
   0xa   :  { %3025 = vst [vmem:[#allocation11_spill] sm:$0xff] %v1445_v11  ;;  %v1558_v39 = vld [vmem:[%s2934_s0 + $0x1f8] sm:$0xff]  ;;  %v1563_v40 = vld [vmem:[%s2934_s0 + $0xf0] sm:$0xff]  ;;  %v127_v42 = vadd.f32 %v1548_v37, %v1543_v36  ;;  %v1599_v49 = vld [vmem:[%s2934_s0 + $0x1e0] sm:$0xff] }
   0xb   :  { %3026 = vst [vmem:[#allocation12_spill] sm:$0xff] %v1450_v12  ;;  %v1568_v41 = vld [vmem:[%s2934_s0 + $0xf8] sm:$0xff]  ;;  %v178_v43 = vadd.f32 %v1558_v39, %v1553_v38  ;;  %v1579_v45 = vld [vmem:[%s2934_s0 + $0x1d0] sm:$0xff]  ;;  %v1604_v50 = vld [vmem:[%s2934_s0 + $0x1e8] sm:$0xff] }
   0xc   :  { %3027 = vst [vmem:[#allocation13_spill] sm:$0xff] %v1455_v13  ;;  %101 = vadd.xlane.f32.xlu2 %v100_v15  ;;  %v130_v44 = vadd.f32 %v1568_v41, %v1563_v40  ;;  %v1584_v46 = vld [vmem:[%s2934_s0 + $0x1d8] sm:$0xff]  ;;  %v1589_v47 = vld [vmem:[%s2934_s0 + $0xd0] sm:$0xff]  ;;  %v175_v53 = vadd.f32 %v1604_v50, %v1599_v49  ;;  %v1625_v56 = vld [vmem:[%s2934_s0 + $0x1c0] sm:$0xff] }
   0xd   :  { %3028 = vst [vmem:[#allocation14_spill] sm:$0xff] %v1460_v14  ;;  %95 = vadd.xlane.f32.xlu1 %v94_v16  ;;  %v1594_v48 = vld [vmem:[%s2934_s0 + $0xd8] sm:$0xff]  ;;  %v172_v51 = vadd.f32 %v1584_v46, %v1579_v45  ;;  %v1615_v54 = vld [vmem:[%s2934_s0 + $0x1b0] sm:$0xff]  ;;  %v1630_v57 = vld [vmem:[%s2934_s0 + $0x1c8] sm:$0xff] }
   0xe   :  { %89 = vadd.xlane.f32.xlu0 %v88_v17  ;;  %v124_v52 = vadd.f32 %v1594_v48, %v1589_v47  ;;  %v1620_v55 = vld [vmem:[%s2934_s0 + $0x1b8] sm:$0xff]  ;;  %v1635_v58 = vld [vmem:[%s2934_s0 + $0xc0] sm:$0xff]  ;;  %v1640_v59 = vld [vmem:[%s2934_s0 + $0xc8] sm:$0xff]  ;;  %v169_v61 = vadd.f32 %v1630_v57, %v1625_v56 }
   0xf   :  { %v166_v60 = vadd.f32 %v1620_v55, %v1615_v54  ;;  %v121_v62 = vadd.f32 %v1640_v59, %v1635_v58  ;;  %v1651_v63 = vld [vmem:[%s2934_s0 + $0x180] sm:$0xff]  ;;  %v1656_v3 = vld [vmem:[%s2934_s0 + $0x188] sm:$0xff]  ;;  %v1661_v7 = vld [vmem:[%s2934_s0 + $0x190] sm:$0xff] }
  0x10   :  { %v1666_v8 = vld [vmem:[%s2934_s0 + $0x198] sm:$0xff]  ;;  %v1671_v15 = vld [vmem:[%s2934_s0 + $0x1a0] sm:$0xff]  ;;  %v1676_v16 = vld [vmem:[%s2934_s0 + $0x1a8] sm:$0xff]  ;;  %v157_v17 = vadd.f32 %v1656_v3, %v1651_v63 }
  0x11   :  { %v1764_v6 = vld [vmem:[%s2934_s0 + $0x108] sm:$0xff]  ;;  %v1769_v5 = vld [vmem:[%s2934_s0 + $0x110] sm:$0xff] }
  0x12   :  { %3037 = vst [vmem:[#allocation23_spill] sm:$0xff] %v1764_v6 }
  0x13   :  { %3038 = vst [vmem:[#allocation24_spill] sm:$0xff] %v1769_v5 }
  0x14   :  { %110 = vadd.xlane.f32.xlu2 %v109_v24  ;;  %v160_v24 = vadd.f32 %v1666_v8, %v1661_v7 }
  0x15   :  { %107 = vadd.xlane.f32.xlu1 %v106_v25  ;;  %v163_v25 = vadd.f32 %v1676_v16, %v1671_v15 }
  0x16   :  { %104 = vadd.xlane.f32.xlu0 %v103_v26  ;;  %v1687_v26 = vld [vmem:[%s2934_s0 + $0x150] sm:$0xff] }
  0x1c   :  { %119 = vadd.xlane.f32.xlu2 %v118_v33  ;;  %v1692_v33 = vld [vmem:[%s2934_s0 + $0x158] sm:$0xff] }
  0x1d   :  { %116 = vadd.xlane.f32.xlu1 %v115_v34  ;;  %3029 = vst [vmem:[#allocation15_spill] sm:$0xff] %v1692_v33  ;;  %v1697_v34 = vld [vmem:[%s2934_s0 + $0x160] sm:$0xff] }
  0x1e   :  { %113 = vadd.xlane.f32.xlu0 %v112_v35  ;;  %v1702_v35 = vld [vmem:[%s2934_s0 + $0x168] sm:$0xff] }
  0x24   :  { %128 = vadd.xlane.f32.xlu2 %v127_v42  ;;  %v1707_v42 = vld [vmem:[%s2934_s0 + $0x170] sm:$0xff] }
  0x25   :  { %179 = vadd.xlane.f32.xlu1 %v178_v43  ;;  %v1712_v43 = vld [vmem:[%s2934_s0 + $0x178] sm:$0xff] }
  0x26   :  { %131 = vadd.xlane.f32.xlu0 %v130_v44  ;;  %v148_v44 = vadd.f32 %v1692_v33, %v1687_v26 }
  0x2c   :  { %173 = vadd.xlane.f32.xlu2 %v172_v51  ;;  %v151_v51 = vadd.f32 %v1702_v35, %v1697_v34 }
  0x2d   :  { %125 = vadd.xlane.f32.xlu1 %v124_v52  ;;  %v154_v52 = vadd.f32 %v1712_v43, %v1707_v42 }
  0x2e   :  { %176 = vadd.xlane.f32.xlu0 %v175_v53  ;;  %v1723_v53 = vld [vmem:[%s2934_s0 + $0x120] sm:$0xff] }
  0x2f   :  { %3030 = vst [vmem:[#allocation16_spill] sm:$0xff] %v1723_v53 }
  0x34   :  { %167 = vadd.xlane.f32.xlu2 %v166_v60  ;;  %v1728_v60 = vld [vmem:[%s2934_s0 + $0x128] sm:$0xff] }
  0x35   :  { %170 = vadd.xlane.f32.xlu1 %v169_v61  ;;  %3031 = vst [vmem:[#allocation17_spill] sm:$0xff] %v1728_v60  ;;  %v1733_v61 = vld [vmem:[%s2934_s0 + $0x130] sm:$0xff] }
  0x36   :  { %122 = vadd.xlane.f32.xlu0 %v121_v62  ;;  %3032 = vst [vmem:[#allocation18_spill] sm:$0xff] %v1733_v61  ;;  %v1738_v62 = vld [vmem:[%s2934_s0 + $0x138] sm:$0xff] }
  0x37   :  { %3033 = vst [vmem:[#allocation19_spill] sm:$0xff] %v1738_v62 }
  0x3c   :  { %158 = vadd.xlane.f32.xlu2 %v157_v17  ;;  %v1743_v17 = vld [vmem:[%s2934_s0 + $0x140] sm:$0xff] }
  0x3d   :  { %161 = vadd.xlane.f32.xlu1 %v160_v24  ;;  %3034 = vst [vmem:[#allocation20_spill] sm:$0xff] %v1743_v17  ;;  %v1748_v24 = vld [vmem:[%s2934_s0 + $0x148] sm:$0xff] }
  0x3e   :  { %164 = vadd.xlane.f32.xlu0 %v163_v25  ;;  %3035 = vst [vmem:[#allocation21_spill] sm:$0xff] %v1748_v24  ;;  %v139_v25 = vadd.f32 %v1728_v60, %v1723_v53 }
  0x44   :  { %149 = vadd.xlane.f32.xlu2 %v148_v44  ;;  %v142_v44 = vadd.f32 %v1738_v62, %v1733_v61 }
  0x45   :  { %152 = vadd.xlane.f32.xlu1 %v151_v51  ;;  %v145_v51 = vadd.f32 %v1748_v24, %v1743_v17 }
  0x46   :  { %155 = vadd.xlane.f32.xlu0 %v154_v52  ;;  %v1759_v52 = vld [vmem:[%s2934_s0 + $0x100] sm:$0xff] }
  0x47   :  { %3036 = vst [vmem:[#allocation22_spill] sm:$0xff] %v1759_v52 }
  0x4c   :  { %140 = vadd.xlane.f32.xlu2 %v139_v25  ;;  %v1774_v25 = vld [vmem:[%s2934_s0 + $0x118] sm:$0xff] }
  0x4d   :  { %143 = vadd.xlane.f32.xlu1 %v142_v44  ;;  %3039 = vst [vmem:[#allocation25_spill] sm:$0xff] %v1774_v25  ;;  %v133_v44 = vadd.f32 %v1764_v6, %v1759_v52 }
  0x4e   :  { %146 = vadd.xlane.f32.xlu0 %v145_v51  ;;  %v136_v51 = vadd.f32 %v1774_v25, %v1769_v5 }
  0x55   :  { %134 = vadd.xlane.f32.xlu1 %v133_v44 }
  0x56   :  { %137 = vadd.xlane.f32.xlu0 %v136_v51 }
  0x77   :  { %v1780_v4 = vpop.xlane.xlu2 %98 }
  0x78   :  { %v1782_v2 = vpop.xlane.xlu1 %92 }
  0x79   :  { %3040 = vst [vmem:[#allocation26_spill] sm:$0xff] %v1782_v2  ;;  %v1784_v14 = vpop.xlane.xlu0 %86 }
  0x7a   :  { %3041 = vst [vmem:[#allocation27_spill] sm:$0xff] %v1784_v14 }
  0x7f   :  { %v1786_v13 = vpop.xlane.xlu2 %101 }
  0x80   :  { %v1788_v60 = vpop.xlane.xlu1 %95 }
  0x81   :  { %v1790_v53 = vpop.xlane.xlu0 %89 }
  0x82   :  { %3042 = vst [vmem:[#allocation28_spill] sm:$0xff] %v1790_v53 }
  0x87   :  { %v1792_v24 = vpop.xlane.xlu2 %110 }
  0x88   :  { %v1794_v6 = vpop.xlane.xlu1 %107 }
  0x89   :  { %v1796_v52 = vpop.xlane.xlu0 %104 }
  0x8f   :  { %v120_v44 = vpop.xlane.xlu2 %119 }
  0x90   :  { %v1798_v51 = vpop.xlane.xlu1 %116 }
  0x91   :  { %v1800_v25 = vpop.xlane.xlu0 %113 }
  0x97   :  { %v129_v5 = vpop.xlane.xlu2 %128 }
  0x98   :  { %v180_v17 = vpop.xlane.xlu1 %179 }
  0x99   :  { %v132_v14 = vpop.xlane.xlu0 %131 }
  0x9a   :  { %v196_v62 = vadd.f32 %v180_v17, %v132_v14 }
  0x9c   :  { %v212_v61 = vmul.f32 0.001953125, %v196_v62 }
  0x9e   :  { %v1803_v12 = vsub.f32 %v1553_v38, %v212_v61  ;;  %v1806_v53 = vsub.f32 %v1558_v39, %v212_v61  ;;  %v1809_v11 = vsub.f32 %v1563_v40, %v212_v61  ;;  %v1812_v2 = vsub.f32 %v1568_v41, %v212_v61 }
  0x9f   :  { %v174_v10 = vpop.xlane.xlu2 %173 }
  0xa0   :  { %3043 = vst [vmem:[#allocation29_spill] sm:$0xff] %v1803_v12  ;;  %v339_v9 = vmul.f32 %v1803_v12, %v1803_v12  ;;  %v340_v14 = vmul.f32 %v1806_v53, %v1806_v53  ;;  %v307_v38 = vmul.f32 %v1809_v11, %v1809_v11  ;;  %v308_v39 = vmul.f32 %v1812_v2, %v1812_v2  ;;  %v126_v62 = vpop.xlane.xlu1 %125 }
  0xa1   :  { %3044 = vst [vmem:[#allocation30_spill] sm:$0xff] %v1806_v53  ;;  %v177_v17 = vpop.xlane.xlu0 %176  ;;  %v194_v40 = vadd.f32 %v174_v10, %v126_v62 }
  0xa2   :  { %3045 = vst [vmem:[#allocation31_spill] sm:$0xff] %v1809_v11  ;;  %v195_v1 = vadd.f32 %v177_v17, %v129_v5  ;;  %v434_v0 = vadd.f32 %v340_v14, %v339_v9  ;;  %v386_v41 = vadd.f32 %v308_v39, %v307_v38 }
  0xa3   :  { %3046 = vst [vmem:[#allocation32_spill] sm:$0xff] %v1812_v2  ;;  %v210_v61 = vmul.f32 0.001953125, %v194_v40 }
  0xa4   :  { %v211_v33 = vmul.f32 0.001953125, %v195_v1  ;;  %435 = vadd.xlane.f32.xlu0 %v434_v0  ;;  %387 = vadd.xlane.f32.xlu2 %v386_v41 }
  0xa5   :  { %v1823_v12 = vsub.f32 %v1589_v47, %v210_v61  ;;  %v1826_v53 = vsub.f32 %v1594_v48, %v210_v61  ;;  %v1841_v0 = vsub.f32 %v1579_v45, %v210_v61  ;;  %v1856_v14 = vsub.f32 %v1584_v46, %v210_v61 }
  0xa6   :  { %v1829_v11 = vsub.f32 %v1599_v49, %v211_v33  ;;  %v1832_v2 = vsub.f32 %v1604_v50, %v211_v33  ;;  %v1835_v5 = vsub.f32 %v1543_v36, %v211_v33  ;;  %v1838_v9 = vsub.f32 %v1548_v37, %v211_v33 }
  0xa7   :  { %3047 = vst [vmem:[#allocation33_spill] sm:$0xff] %v1826_v53  ;;  %v168_v1 = vpop.xlane.xlu2 %167  ;;  %v303_v10 = vmul.f32 %v1823_v12, %v1823_v12  ;;  %v304_v47 = vmul.f32 %v1826_v53, %v1826_v53 }
  0xa8   :  { %v337_v48 = vmul.f32 %v1829_v11, %v1829_v11  ;;  %v338_v36 = vmul.f32 %v1832_v2, %v1832_v2  ;;  %v192_v49 = vadd.f32 %v168_v1, %v120_v44  ;;  %v171_v50 = vpop.xlane.xlu1 %170  ;;  %v305_v45 = vmul.f32 %v1835_v5, %v1835_v5 }
  0xa9   :  { %v123_v37 = vpop.xlane.xlu0 %122  ;;  %v306_v33 = vmul.f32 %v1838_v9, %v1838_v9  ;;  %v380_v39 = vadd.f32 %v304_v47, %v303_v10  ;;  %v335_v44 = vmul.f32 %v1841_v0, %v1841_v0  ;;  %v336_v1 = vmul.f32 %v1856_v14, %v1856_v14 }
  0xaa   :  { %v193_v38 = vadd.f32 %v171_v50, %v123_v37  ;;  %v431_v62 = vadd.f32 %v338_v36, %v337_v48  ;;  %v208_v41 = vmul.f32 0.001953125, %v192_v49 }
  0xab   :  { %v383_v17 = vadd.f32 %v306_v33, %v305_v45  ;;  %v428_v50 = vadd.f32 %v336_v1, %v335_v44 }
  0xac   :  { %v209_v40 = vmul.f32 0.001953125, %v193_v38  ;;  %381 = vadd.xlane.f32.xlu0 %v380_v39  ;;  %432 = vadd.xlane.f32.xlu2 %v431_v62  ;;  %v1891_v39 = vsub.f32 %v1507_v27, %v208_v41  ;;  %v1894_v62 = vsub.f32 %v1512_v28, %v208_v41 }
  0xad   :  { %384 = vadd.xlane.f32.xlu1 %v383_v17 }
  0xae   :  { %v1863_v53 = vsub.f32 %v1625_v56, %v209_v40  ;;  %v1866_v46 = vsub.f32 %v1630_v57, %v209_v40  ;;  %v1869_v61 = vsub.f32 %v1635_v58, %v209_v40  ;;  %v1872_v10 = vsub.f32 %v1640_v59, %v209_v40 }
  0xaf   :  { %v1883_v58 = vsub.f32 %v1615_v54, %v208_v41  ;;  %v1886_v59 = vsub.f32 %v1620_v55, %v208_v41  ;;  %v299_v28 = vmul.f32 %v1891_v39, %v1891_v39  ;;  %v300_v41 = vmul.f32 %v1894_v62, %v1894_v62 }
  0xb0   :  { %v333_v47 = vmul.f32 %v1863_v53, %v1863_v53  ;;  %v334_v48 = vmul.f32 %v1866_v46, %v1866_v46  ;;  %v301_v36 = vmul.f32 %v1869_v61, %v1869_v61  ;;  %v302_v56 = vmul.f32 %v1872_v10, %v1872_v10  ;;  %v162_v57 = vpop.xlane.xlu1 %161 }
  0xb1   :  { %v165_v49 = vpop.xlane.xlu0 %164  ;;  %v190_v37 = vadd.f32 %v162_v57, %v1800_v25  ;;  %v331_v55 = vmul.f32 %v1883_v58, %v1883_v58  ;;  %v332_v25 = vmul.f32 %v1886_v59, %v1886_v59 }
  0xb2   :  { %v191_v45 = vadd.f32 %v165_v49, %v1798_v51  ;;  %v425_v33 = vadd.f32 %v334_v48, %v333_v47  ;;  %v377_v38 = vadd.f32 %v302_v56, %v301_v36  ;;  %v159_v51 = vpop.xlane.xlu2 %158 }
  0xb3   :  { %v206_v54 = vmul.f32 0.001953125, %v190_v37  ;;  %v189_v47 = vadd.f32 %v159_v51, %v1792_v24  ;;  %v374_v37 = vadd.f32 %v300_v41, %v299_v28 }
  0xb4   :  { %v207_v17 = vmul.f32 0.001953125, %v191_v45  ;;  %426 = vadd.xlane.f32.xlu0 %v425_v33  ;;  %378 = vadd.xlane.f32.xlu2 %v377_v38 }
  0xb5   :  { %429 = vadd.xlane.f32.xlu1 %v428_v50  ;;  %v1916_v36 = vsub.f32 %v1527_v31, %v206_v54  ;;  %v1923_v49 = vsub.f32 %v1661_v7, %v206_v54  ;;  %v1926_v50 = vsub.f32 %v1666_v8, %v206_v54  ;;  %v205_v31 = vmul.f32 0.001953125, %v189_v47 }
  0xb6   :  { %v1901_v40 = vsub.f32 %v1517_v29, %v207_v17  ;;  %v1904_v27 = vsub.f32 %v1522_v30, %v207_v17  ;;  %v422_v29 = vadd.f32 %v332_v25, %v331_v55  ;;  %v1919_v30 = vsub.f32 %v1532_v32, %v206_v54 }
  0xb7   :  { %v1929_v24 = vsub.f32 %v1671_v15, %v207_v17  ;;  %v1932_v45 = vsub.f32 %v1676_v16, %v207_v17  ;;  %v327_v33 = vmul.f32 %v1923_v49, %v1923_v49  ;;  %v328_v15 = vmul.f32 %v1926_v50, %v1926_v50 }
  0xb8   :  { %v297_v44 = vmul.f32 %v1901_v40, %v1901_v40  ;;  %v298_v1 = vmul.f32 %v1904_v27, %v1904_v27  ;;  %v153_v32 = vpop.xlane.xlu1 %152  ;;  %v296_v8 = vmul.f32 %v1919_v30, %v1919_v30  ;;  %v1948_v54 = vsub.f32 %v1651_v63, %v205_v31 }
  0xb9   :  { %v156_v48 = vpop.xlane.xlu0 %155  ;;  %v329_v16 = vmul.f32 %v1929_v24, %v1929_v24  ;;  %v330_v38 = vmul.f32 %v1932_v45, %v1932_v45  ;;  %v187_v17 = vadd.f32 %v153_v32, %v1796_v52  ;;  %v1951_v55 = vsub.f32 %v1656_v3, %v205_v31 }
  0xba   :  { %v188_v56 = vadd.f32 %v156_v48, %v1794_v6  ;;  %v371_v57 = vadd.f32 %v298_v1, %v297_v44  ;;  %v295_v6 = vmul.f32 %v1916_v36, %v1916_v36  ;;  %v416_v51 = vadd.f32 %v328_v15, %v327_v33  ;;  %v150_v47 = vpop.xlane.xlu2 %149 }
  0xbb   :  { %v419_v44 = vadd.f32 %v330_v38, %v329_v16  ;;  %v1960_v1 = vsub.f32 %v1471_v18, %v205_v31  ;;  %v1963_v52 = vsub.f32 %v1476_v19, %v205_v31  ;;  %v203_v63 = vmul.f32 0.001953125, %v187_v17 }
  0xbc   :  { %423 = vadd.xlane.f32.xlu2 %v422_v29  ;;  %372 = vadd.xlane.f32.xlu0 %v371_v57  ;;  %v204_v7 = vmul.f32 0.001953125, %v188_v56  ;;  %v368_v25 = vadd.f32 %v296_v8, %v295_v6  ;;  %v325_v3 = vmul.f32 %v1948_v54, %v1948_v54  ;;  %v186_v56 = vadd.f32 %v150_v47, %v1786_v13 }
  0xbd   :  { %375 = vadd.xlane.f32.xlu1 %v374_v37  ;;  %v293_v19 = vmul.f32 %v1960_v1, %v1960_v1  ;;  %v294_v29 = vmul.f32 %v1963_v52, %v1963_v52  ;;  %v1979_v37 = vsub.f32 %v1491_v22, %v203_v63  ;;  %v1982_v31 = vsub.f32 %v1496_v23, %v203_v63 }
  0xbe   :  { %v1954_v28 = vsub.f32 %v1481_v20, %v204_v7  ;;  %v1957_v41 = vsub.f32 %v1486_v21, %v204_v7  ;;  %v326_v20 = vmul.f32 %v1951_v55, %v1951_v55  ;;  %v1986_v8 = vsub.f32 %v1697_v34, %v203_v63 }
  0xbf   :  { %v1989_v33 = vsub.f32 %v1702_v35, %v203_v63  ;;  %v365_v15 = vadd.f32 %v294_v29, %v293_v19  ;;  %v1992_v16 = vsub.f32 %v1707_v42, %v204_v7  ;;  %v1995_v13 = vsub.f32 %v1712_v43, %v204_v7  ;;  %v3055_v19 = vld [vmem:[#allocation9_spill] sm:$0xff] }
  0xc0   :  { %v291_v21 = vmul.f32 %v1954_v28, %v1954_v28  ;;  %v292_v18 = vmul.f32 %v1957_v41, %v1957_v41  ;;  %v413_v57 = vadd.f32 %v326_v20, %v325_v3  ;;  %v202_v22 = vmul.f32 0.001953125, %v186_v56  ;;  %v144_v23 = vpop.xlane.xlu1 %143  ;;  %v3051_v20 = vld [vmem:[#allocation3_spill] sm:$0xff]  ;;  %v3057_v56 = vld [vmem:[#allocation10_spill] sm:$0xff] }
  0xc1   :  { %v147_v48 = vpop.xlane.xlu0 %146  ;;  %v290_v35 = vmul.f32 %v1982_v31, %v1982_v31  ;;  %v321_v38 = vmul.f32 %v1986_v8, %v1986_v8  ;;  %v322_v42 = vmul.f32 %v1989_v33, %v1989_v33  ;;  %v323_v43 = vmul.f32 %v1992_v16, %v1992_v16 }
  0xc2   :  { %v185_v6 = vadd.f32 %v147_v48, %v1780_v4  ;;  %v362_v32 = vadd.f32 %v292_v18, %v291_v21  ;;  %v289_v4 = vmul.f32 %v1979_v37, %v1979_v37  ;;  %v324_v7 = vmul.f32 %v1995_v13, %v1995_v13  ;;  %v3053_v21 = vld [vmem:[#allocation4_spill] sm:$0xff] }
  0xc3   :  { %v184_v17 = vadd.f32 %v144_v23, %v1788_v60  ;;  %v407_v3 = vadd.f32 %v322_v42, %v321_v38  ;;  %v2023_v29 = vsub.f32 %v3055_v19, %v202_v22  ;;  %v2026_v60 = vsub.f32 %v3057_v56, %v202_v22  ;;  %v3059_v42 = vld [vmem:[#allocation26_spill] sm:$0xff] }
  0xc4   :  { %369 = vadd.xlane.f32.xlu2 %v368_v25  ;;  %417 = vadd.xlane.f32.xlu0 %v416_v51  ;;  %v201_v34 = vmul.f32 0.001953125, %v185_v6  ;;  %v2011_v25 = vsub.f32 %v1687_v26, %v202_v22  ;;  %v3049_v51 = vld [vmem:[#allocation15_spill] sm:$0xff]  ;;  %v359_v63 = vadd.f32 %v290_v35, %v289_v4  ;;  %v410_v48 = vadd.f32 %v324_v7, %v323_v43  ;;  %v3065_v19 = vld [vmem:[#allocation18_spill] sm:$0xff] }
  0xc5   :  { %420 = vadd.xlane.f32.xlu1 %v419_v44  ;;  %v2014_v44 = vsub.f32 %v3049_v51, %v202_v22  ;;  %3056 = vst [vmem:[#allocation9_spill] sm:$0xff] %v2023_v29  ;;  %v200_v26 = vmul.f32 0.001953125, %v184_v17  ;;  %v1365_v23 = vmov 0   ;;  %v287_v35 = vmul.f32 %v2023_v29, %v2023_v29  ;;  %v3060_v17 = vld [vmem:[#allocation11_spill] sm:$0xff] }
  0xc6   :  { %3048 = vst [vmem:[#allocation34_spill] sm:$0xff] %v2011_v25  ;;  %v2017_v47 = vsub.f32 %v3051_v20, %v201_v34  ;;  %v2020_v18 = vsub.f32 %v3053_v21, %v201_v34  ;;  %1315 = vset.pattern.permute.xlu1 %v1365_v23  ;;  %1316 = vset.pattern.permute.xlu2 %v1365_v23  ;;  %v3064_v20 = vld [vmem:[#allocation28_spill] sm:$0xff] }
  0xc7   :  { %3050 = vst [vmem:[#allocation15_spill] sm:$0xff] %v2014_v44  ;;  %v320_v6 = vmul.f32 %v2014_v44, %v2014_v44  ;;  %v288_v38 = vmul.f32 %v2026_v60, %v2026_v60  ;;  %1314 = vset.pattern.permute.xlu0 %v1365_v23  ;;  %v2042_v51 = vsub.f32 %v3060_v17, %v200_v26  ;;  %v3069_v23 = vld [vmem:[#allocation20_spill] sm:$0xff] }
  0xc8   :  { %3052 = vst [vmem:[#allocation3_spill] sm:$0xff] %v2017_v47  ;;  %v286_v4 = vmul.f32 %v2020_v18, %v2020_v18  ;;  %v2049_v56 = vsub.f32 %v3065_v19, %v200_v26 }
  0xc9   :  { %3054 = vst [vmem:[#allocation4_spill] sm:$0xff] %v2020_v18  ;;  %v138_v22 = vpop.xlane.xlu0 %137  ;;  %v3067_v18 = vld [vmem:[#allocation19_spill] sm:$0xff]  ;;  %v356_v44 = vadd.f32 %v288_v38, %v287_v35 }
  0xca   :  { %3058 = vst [vmem:[#allocation10_spill] sm:$0xff] %v2026_v60  ;;  %v182_v21 = vadd.f32 %v138_v22, %v3064_v20  ;;  %v135_v22 = vpop.xlane.xlu1 %134  ;;  %v3073_v38 = vld [vmem:[#allocation27_spill] sm:$0xff]  ;;  %v3076_v20 = vld [vmem:[#allocation17_spill] sm:$0xff] }
  0xcb   :  { %3061 = vst [vmem:[#allocation26_spill] sm:$0xff] %v2042_v51 }
  0xcc   :  { %414 = vadd.xlane.f32.xlu2 %v413_v57  ;;  %363 = vadd.xlane.f32.xlu0 %v362_v32  ;;  %v319_v57 = vmul.f32 %v2011_v25, %v2011_v25  ;;  %v141_v32 = vpop.xlane.xlu2 %140  ;;  %v2055_v25 = vsub.f32 %v3069_v23, %v201_v34  ;;  %v3080_v23 = vld [vmem:[#allocation14_spill] sm:$0xff] }
  0xcd   :  { %366 = vadd.xlane.f32.xlu1 %v365_v15  ;;  %v285_v15 = vmul.f32 %v2017_v47, %v2017_v47  ;;  %v183_v43 = vadd.f32 %v141_v32, %v3059_v42  ;;  %v2052_v47 = vsub.f32 %v3067_v18, %v200_v26  ;;  %v198_v18 = vmul.f32 0.001953125, %v182_v21 }
  0xce   :  { %v404_v7 = vadd.f32 %v320_v6, %v319_v57  ;;  %3070 = vst [vmem:[#allocation18_spill] sm:$0xff] %v2055_v25  ;;  %v3071_v57 = vld [vmem:[#allocation21_spill] sm:$0xff]  ;;  %v181_v42 = vadd.f32 %v135_v22, %v3073_v38 }
  0xcf   :  { %3068 = vst [vmem:[#allocation28_spill] sm:$0xff] %v2052_v47  ;;  %v2058_v6 = vsub.f32 %v3071_v57, %v201_v34  ;;  %v199_v32 = vmul.f32 0.001953125, %v183_v43  ;;  %v316_v35 = vmul.f32 %v2052_v47, %v2052_v47  ;;  %v317_v34 = vmul.f32 %v2055_v25, %v2055_v25 }
  0xd0   :  { %v2083_v57 = vsub.f32 %v3080_v23, %v198_v18 }
  0xd1   :  { %3072 = vst [vmem:[#allocation19_spill] sm:$0xff] %v2058_v6  ;;  %v2077_v21 = vsub.f32 %v3076_v20, %v199_v32  ;;  %v3092_v20 = vld [vmem:[#allocation23_spill] sm:$0xff] }
  0xd3   :  { %3077 = vst [vmem:[#allocation21_spill] sm:$0xff] %v2077_v21 }
  0xd4   :  { %360 = vadd.xlane.f32.xlu2 %v359_v63  ;;  %408 = vadd.xlane.f32.xlu0 %v407_v3  ;;  %v3062_v63 = vld [vmem:[#allocation12_spill] sm:$0xff] }
  0xd5   :  { %411 = vadd.xlane.f32.xlu1 %v410_v48  ;;  %v2045_v3 = vsub.f32 %v3062_v63, %v200_v26  ;;  %v353_v48 = vadd.f32 %v286_v4, %v285_v15  ;;  %3066 = vst [vmem:[#allocation12_spill] sm:$0xff] %v2049_v56  ;;  %v283_v15 = vmul.f32 %v2042_v51, %v2042_v51 }
  0xd6   :  { %v315_v26 = vmul.f32 %v2049_v56, %v2049_v56  ;;  %v3082_v56 = vld [vmem:[#allocation5_spill] sm:$0xff] }
  0xd7   :  { %3063 = vst [vmem:[#allocation11_spill] sm:$0xff] %v2045_v3  ;;  %v284_v4 = vmul.f32 %v2045_v3, %v2045_v3  ;;  %v2086_v25 = vsub.f32 %v3082_v56, %v199_v32  ;;  %v280_v56 = vmul.f32 %v2083_v57, %v2083_v57 }
  0xd8   :  { %v398_v63 = vadd.f32 %v316_v35, %v315_v26  ;;  %v314_v26 = vmul.f32 %v2077_v21, %v2077_v21  ;;  %v3096_v21 = vld [vmem:[#allocation25_spill] sm:$0xff] }
  0xd9   :  { %v350_v43 = vadd.f32 %v284_v4, %v283_v15  ;;  %3083 = vst [vmem:[#allocation17_spill] sm:$0xff] %v2086_v25  ;;  %v197_v15 = vmul.f32 0.001953125, %v181_v42 }
  0xdc   :  { %405 = vadd.xlane.f32.xlu2 %v404_v7  ;;  %354 = vadd.xlane.f32.xlu0 %v353_v48  ;;  %v3074_v7 = vld [vmem:[#allocation16_spill] sm:$0xff]  ;;  %v3078_v48 = vld [vmem:[#allocation13_spill] sm:$0xff] }
  0xdd   :  { %357 = vadd.xlane.f32.xlu1 %v356_v44  ;;  %v318_v44 = vmul.f32 %v2058_v6, %v2058_v6  ;;  %v2074_v17 = vsub.f32 %v3074_v7, %v199_v32  ;;  %v2080_v19 = vsub.f32 %v3078_v48, %v198_v18  ;;  %3081 = vst [vmem:[#allocation16_spill] sm:$0xff] %v2083_v57  ;;  %v3084_v6 = vld [vmem:[#allocation6_spill] sm:$0xff]  ;;  %v3094_v57 = vld [vmem:[#allocation24_spill] sm:$0xff] }
  0xde   :  { %v2089_v22 = vsub.f32 %v3084_v6, %v199_v32  ;;  %v281_v6 = vmul.f32 %v2086_v25, %v2086_v25  ;;  %v3090_v7 = vld [vmem:[#allocation22_spill] sm:$0xff]  ;;  %v2113_v48 = vsub.f32 %v3092_v20, %v197_v15 }
  0xdf   :  { %3075 = vst [vmem:[#allocation20_spill] sm:$0xff] %v2074_v17  ;;  %v401_v47 = vadd.f32 %v318_v44, %v317_v34  ;;  %v313_v4 = vmul.f32 %v2074_v17, %v2074_v17  ;;  %v279_v35 = vmul.f32 %v2080_v19, %v2080_v19  ;;  %v3086_v34 = vld [vmem:[#allocation7_spill] sm:$0xff]  ;;  %v3088_v44 = vld [vmem:[#allocation8_spill] sm:$0xff]  ;;  %v2119_v17 = vsub.f32 %v3096_v21, %v198_v18 }
  0xe0   :  { %3079 = vst [vmem:[#allocation27_spill] sm:$0xff] %v2080_v19  ;;  %v282_v32 = vmul.f32 %v2089_v22, %v2089_v22  ;;  %v2107_v38 = vsub.f32 %v3088_v44, %v197_v15  ;;  %v2116_v19 = vsub.f32 %v3094_v57, %v198_v18  ;;  %v685_v44 = vld [vmem:[%s2935_s2 + $0x40] sm:$0xff] }
  0xe1   :  { %3085 = vst [vmem:[#allocation13_spill] sm:$0xff] %v2089_v22  ;;  %v395_v42 = vadd.f32 %v314_v26, %v313_v4  ;;  %v312_v18 = vmul.f32 %v2119_v17, %v2119_v17 }
  0xe2   :  { %3089 = vst [vmem:[#allocation5_spill] sm:$0xff] %v2107_v38  ;;  %v347_v23 = vadd.f32 %v282_v32, %v281_v6  ;;  %v278_v26 = vmul.f32 %v2107_v38, %v2107_v38  ;;  %v311_v57 = vmul.f32 %v2116_v19, %v2116_v19  ;;  %v688_v32 = vld [vmem:[%s2935_s2 + $0x58] sm:$0xff] }
  0xe3   :  { %3093 = vst [vmem:[#allocation7_spill] sm:$0xff] %v2113_v48 }
  0xe4   :  { %351 = vadd.xlane.f32.xlu2 %v350_v43  ;;  %399 = vadd.xlane.f32.xlu0 %v398_v63  ;;  %v344_v43 = vadd.f32 %v280_v56, %v279_v35  ;;  %v2110_v63 = vsub.f32 %v3090_v7, %v197_v15  ;;  %3095 = vst [vmem:[#allocation8_spill] sm:$0xff] %v2116_v19 }
  0xe5   :  { %402 = vadd.xlane.f32.xlu1 %v401_v47  ;;  %v2104_v47 = vsub.f32 %v3086_v34, %v197_v15  ;;  %3097 = vst [vmem:[#allocation22_spill] sm:$0xff] %v2119_v17  ;;  %v310_v35 = vmul.f32 %v2113_v48, %v2113_v48  ;;  %v392_v6 = vadd.f32 %v312_v18, %v311_v57  ;;  %v691_v34 = vld [vmem:[%s2935_s2 + $0x70] sm:$0xff] }
  0xe6   :  { %3091 = vst [vmem:[#allocation6_spill] sm:$0xff] %v2110_v63  ;;  %v309_v15 = vmul.f32 %v2110_v63, %v2110_v63 }
  0xe7   :  { %3087 = vst [vmem:[#allocation14_spill] sm:$0xff] %v2104_v47  ;;  %v277_v4 = vmul.f32 %v2104_v47, %v2104_v47 }
  0xe8   :  { %v389_v56 = vadd.f32 %v310_v35, %v309_v15  ;;  %v689_v15 = vld [vmem:[%s2935_s2 + $0x60] sm:$0xff] }
  0xe9   :  { %v341_v21 = vadd.f32 %v278_v26, %v277_v4  ;;  %v682_v4 = vld [vmem:[%s2935_s2 + $0x28] sm:$0xff] }
  0xec   :  { %396 = vadd.xlane.f32.xlu2 %v395_v42  ;;  %345 = vadd.xlane.f32.xlu0 %v344_v43  ;;  %v690_v42 = vld [vmem:[%s2935_s2 + $0x68] sm:$0xff] }
  0xed   :  { %348 = vadd.xlane.f32.xlu1 %v347_v23  ;;  %v692_v23 = vld [vmem:[%s2935_s2 + $0x78] sm:$0xff] }
  0xf4   :  { %342 = vadd.xlane.f32.xlu2 %v341_v21  ;;  %390 = vadd.xlane.f32.xlu0 %v389_v56  ;;  %v687_v56 = vld [vmem:[%s2935_s2 + $0x50] sm:$0xff] }
  0xf5   :  { %393 = vadd.xlane.f32.xlu1 %v392_v6 }
 0x108   :  { %884 = vperm.xlu0 %1314, %v692_v23  }
 0x10c   :  { %864 = vperm.xlu2 %1316, %v688_v32   ;;  %v679_v32 = vld [vmem:[%s2935_s2 + $0x10] sm:$0xff] }
 0x10e   :  { %879 = vperm.xlu1 %1315, %v691_v34  }
 0x110   :  { %859 = vperm.xlu0 %1314, %v687_v56  }
 0x114   :  { %849 = vperm.xlu2 %1316, %v685_v44   ;;  %v686_v44 = vld [vmem:[%s2935_s2 + $0x48] sm:$0xff] }
 0x116   :  { %874 = vperm.xlu1 %1315, %v690_v42  }
 0x117   :  { %v388_v43 = vpop.xlane.xlu2 %387  ;;  %v436_v7 = vpop.xlane.xlu0 %435 }
 0x118   :  { %v452_v20 = vadd.f32 %v436_v7, %v388_v43 }
 0x11a   :  { %v468_v26 = vmul.f32 0.001953125, %v452_v20 }
 0x11c   :  { %v2154_v35 = vadd.f32 1e-05, %v468_v26  ;;  %834 = vperm.xlu2 %1316, %v682_v4  }
 0x11e   :  { %1317 = vrsqrt.f32 %v2154_v35  ;;  %869 = vperm.xlu1 %1315, %v689_v15   ;;  %v684_v15 = vld [vmem:[%s2935_s2 + $0x38] sm:$0xff]  ;;  %vm641_vm3 = vweird.f32 %v2154_v35 }
 0x11f   :  { %v433_v57 = vpop.xlane.xlu2 %432  ;;  %v382_v18 = vpop.xlane.xlu0 %381  ;;  %844 = vperm.xlu0 %1314, %v684_v15  }
 0x120   :  { %v385_v21 = vpop.xlane.xlu1 %384 }
 0x121   :  { %v451_v6 = vadd.f32 %v433_v57, %v385_v21 }
 0x123   :  { %v467_v34 = vmul.f32 0.001953125, %v451_v6 }
 0x124   :  { %v2166_v42 = vpop.eup %1317  ;;  %819 = vperm.xlu2 %1316, %v679_v32   ;;  %v683_v32 = vld [vmem:[%s2935_s2 + $0x30] sm:$0xff] }
 0x125   :  { %v636_v43 = vmul.f32 %v2166_v42, %v2154_v35  ;;  %v483_v7 = vadd.f32 1e-05, %v467_v34  ;;  %vm642_vm1 = vweird.f32 %v2166_v42 }
 0x126   :  { %854 = vperm.xlu1 %1315, %v686_v44   ;;  %vm2206_vm5 = vmor %vm641_vm3, %vm642_vm1 }
 0x127   :  { %1319 = vrsqrt.f32 %v483_v7  ;;  %v379_v20 = vpop.xlane.xlu2 %378  ;;  %v427_v23 = vpop.xlane.xlu0 %426  ;;  %v637_v57 = vmul.f32 %v2166_v42, %v636_v43  ;;  %vm631_vm2 = vweird.f32 %v483_v7 }
 0x128   :  { %v430_v4 = vpop.xlane.xlu1 %429  ;;  %v449_v26 = vadd.f32 %v427_v23, %v379_v20 }
 0x129   :  { %v450_v21 = vadd.f32 %v430_v4, %v382_v18  ;;  %v638_v48 = vmul.f32 0.5, %v637_v57 }
 0x12a   :  { %v465_v56 = vmul.f32 0.001953125, %v449_v26  ;;  %v681_v26 = vld [vmem:[%s2935_s2 + $0x20] sm:$0xff] }
 0x12b   :  { %v466_v6 = vmul.f32 0.001953125, %v450_v21  ;;  %v639_v15 = vsub.f32 1.5, %v638_v48  ;;  %829 = vperm.xlu0 %1314, %v681_v26  }
 0x12c   :  { %v2177_v34 = vadd.f32 1e-05, %v465_v56 }
 0x12d   :  { %v1320_v44 = vpop.eup %1319  ;;  %v2179_v63 = vadd.f32 1e-05, %v466_v6  ;;  %v680_v6 = vld [vmem:[%s2935_s2 + $0x18] sm:$0xff]  ;;  %v640_v48 = vmul.f32 %v2166_v42, %v639_v15 }
 0x12e   :  { %v626_v20 = vmul.f32 %v1320_v44, %v483_v7  ;;  %1321 = vrsqrt.f32 %v2177_v34  ;;  %839 = vperm.xlu1 %1315, %v683_v32   ;;  %vm632_vm0 = vweird.f32 %v1320_v44  ;;  %vm611_vm9 = vweird.f32 %v2177_v34 }
 0x12f   :  { %1323 = vrsqrt.f32 %v2179_v63  ;;  %v424_v18 = vpop.xlane.xlu2 %423  ;;  %v373_v43 = vpop.xlane.xlu0 %372  ;;  %vm633_vm4 = vmor %vm631_vm2, %vm632_vm0  ;;  %v644_v35 = vsel %vm2206_vm5, %v2166_v42, %v640_v48  ;;  %vm621_vm7 = vweird.f32 %v2179_v63 }
 0x130   :  { %v627_v23 = vmul.f32 %v1320_v44, %v626_v20  ;;  %v376_v4 = vpop.xlane.xlu1 %375 }
 0x131   :  { %v448_v21 = vadd.f32 %v424_v18, %v376_v4  ;;  %v659_v4 = vld [vmem:[%s2936_s1 + $0x70] sm:$0xff] }
 0x132   :  { %v628_v57 = vmul.f32 0.5, %v627_v23 }
 0x133   :  { %v464_v56 = vmul.f32 0.001953125, %v448_v21 }
 0x134   :  { %v2189_v32 = vpop.eup %1321  ;;  %v629_v17 = vsub.f32 1.5, %v628_v57 }
 0x135   :  { %v1324_v19 = vpop.eup %1323  ;;  %v606_v20 = vmul.f32 %v2189_v32, %v2177_v34  ;;  %v2194_v38 = vadd.f32 1e-05, %v464_v56  ;;  %vm612_vm10 = vweird.f32 %v2189_v32 }
 0x136   :  { %v616_v18 = vmul.f32 %v1324_v19, %v2179_v63  ;;  %824 = vperm.xlu1 %1315, %v680_v6   ;;  %v630_v23 = vmul.f32 %v1320_v44, %v629_v17  ;;  %vm622_vm6 = vweird.f32 %v1324_v19  ;;  %vm2237_vm11 = vmor %vm611_vm9, %vm612_vm10 }
 0x137   :  { %v607_v26 = vmul.f32 %v2189_v32, %v606_v20  ;;  %1325 = vrsqrt.f32 %v2194_v38  ;;  %v370_v21 = vpop.xlane.xlu2 %369  ;;  %v418_v57 = vpop.xlane.xlu0 %417  ;;  %v660_v20 = vld [vmem:[%s2936_s1 + $0x78] sm:$0xff]  ;;  %vm623_vm8 = vmor %vm621_vm7, %vm622_vm6  ;;  %vm601_vm14 = vweird.f32 %v2194_v38 }
 0x138   :  { %v617_v17 = vmul.f32 %v1324_v19, %v616_v18  ;;  %v421_v15 = vpop.xlane.xlu1 %420  ;;  %v446_v56 = vadd.f32 %v418_v57, %v370_v21  ;;  %v634_v6 = vsel %vm633_vm4, %v1320_v44, %v630_v23  ;;  %v676_v21 = vmul.f32 %v660_v20, %v644_v35 }
 0x139   :  { %v447_v47 = vadd.f32 %v421_v15, %v373_v43  ;;  %v675_v22 = vmul.f32 %v659_v4, %v634_v6  ;;  %v608_v51 = vmul.f32 0.5, %v607_v26 }
 0x13a   :  { %v618_v25 = vmul.f32 0.5, %v617_v17  ;;  %v462_v3 = vmul.f32 0.001953125, %v446_v56 }
 0x13b   :  { %v463_v60 = vmul.f32 0.001953125, %v447_v47  ;;  %767 = vperm.xlu2 %1316, %v675_v22   ;;  %v609_v48 = vsub.f32 1.5, %v608_v51  ;;  %v658_v47 = vld [vmem:[%s2936_s1 + $0x68] sm:$0xff] }
 0x13c   :  { %v619_v29 = vsub.f32 1.5, %v618_v25  ;;  %v2216_v18 = vadd.f32 1e-05, %v462_v3 }
 0x13d   :  { %v2218_v44 = vpop.eup %1325  ;;  %v2220_v43 = vadd.f32 1e-05, %v463_v60  ;;  %v610_v7 = vmul.f32 %v2189_v32, %v609_v48  ;;  %v657_v48 = vld [vmem:[%s2936_s1 + $0x60] sm:$0xff] }
 0x13e   :  { %v596_v42 = vmul.f32 %v2218_v44, %v2194_v38  ;;  %1327 = vrsqrt.f32 %v2216_v18  ;;  %772 = vperm.xlu1 %1315, %v676_v21   ;;  %v620_v22 = vmul.f32 %v1324_v19, %v619_v29  ;;  %vm602_vm12 = vweird.f32 %v2218_v44 }
 0x13f   :  { %1329 = vrsqrt.f32 %v2220_v43  ;;  %v415_v25 = vpop.xlane.xlu2 %414  ;;  %v364_v3 = vpop.xlane.xlu0 %363  ;;  %vm2254_vm15 = vmor %vm601_vm14, %vm602_vm12  ;;  %vm581_vm1 = vweird.f32 %v2216_v18  ;;  %vm591_vm2 = vweird.f32 %v2220_v43 }
 0x140   :  { %v597_v60 = vmul.f32 %v2218_v44, %v596_v42  ;;  %v367_v23 = vpop.xlane.xlu1 %366  ;;  %v624_v26 = vsel %vm623_vm8, %v1324_v19, %v620_v22  ;;  %v614_v42 = vsel %vm2237_vm11, %v2189_v32, %v610_v7 }
 0x141   :  { %v445_v4 = vadd.f32 %v415_v25, %v367_v23  ;;  %v674_v57 = vmul.f32 %v658_v47, %v624_v26 }
 0x142   :  { %v598_v51 = vmul.f32 0.5, %v597_v60 }
 0x143   :  { %v461_v63 = vmul.f32 0.001953125, %v445_v4  ;;  %762 = vperm.xlu2 %1316, %v674_v57   ;;  %v673_v57 = vmul.f32 %v657_v48, %v614_v42  ;;  %v656_v42 = vld [vmem:[%s2936_s1 + $0x58] sm:$0xff] }
 0x144   :  { %v1328_v29 = vpop.eup %1327  ;;  %v599_v34 = vsub.f32 1.5, %v598_v51 }
 0x145   :  { %v1330_v17 = vpop.eup %1329  ;;  %v576_v15 = vmul.f32 %v1328_v29, %v2216_v18  ;;  %v2235_v56 = vadd.f32 1e-05, %v461_v63  ;;  %vm582_vm13 = vweird.f32 %v1328_v29 }
 0x146   :  { %v586_v19 = vmul.f32 %v1330_v17, %v2220_v43  ;;  %vm592_vm0 = vweird.f32 %v1330_v17  ;;  %vm583_vm3 = vmor %vm581_vm1, %vm582_vm13  ;;  %v655_v43 = vld [vmem:[%s2936_s1 + $0x50] sm:$0xff] }
 0x147   :  { %v577_v35 = vmul.f32 %v1328_v29, %v576_v15  ;;  %1331 = vrsqrt.f32 %v2235_v56  ;;  %v361_v20 = vpop.xlane.xlu2 %360  ;;  %v409_v21 = vpop.xlane.xlu0 %408  ;;  %v600_v15 = vmul.f32 %v2218_v44, %v599_v34  ;;  %v654_v34 = vld [vmem:[%s2936_s1 + $0x48] sm:$0xff]  ;;  %vm593_vm4 = vmor %vm591_vm2, %vm592_vm0  ;;  %vm571_vm6 = vweird.f32 %v2235_v56 }
 0x148   :  { %v587_v25 = vmul.f32 %v1330_v17, %v586_v19  ;;  %v412_v22 = vpop.xlane.xlu1 %411  ;;  %v443_v47 = vadd.f32 %v409_v21, %v361_v20 }
 0x149   :  { %v578_v60 = vmul.f32 0.5, %v577_v35  ;;  %v444_v23 = vadd.f32 %v412_v22, %v364_v3  ;;  %v604_v18 = vsel %vm2254_vm15, %v2218_v44, %v600_v15 }
 0x14a   :  { %v588_v4 = vmul.f32 0.5, %v587_v25  ;;  %v459_v26 = vmul.f32 0.001953125, %v443_v47 }
 0x14b   :  { %v579_v51 = vsub.f32 1.5, %v578_v60  ;;  %v460_v63 = vmul.f32 0.001953125, %v444_v23  ;;  %757 = vperm.xlu2 %1316, %v673_v57   ;;  %v672_v57 = vmul.f32 %v656_v42, %v604_v18 }
 0x14c   :  { %v589_v32 = vsub.f32 1.5, %v588_v4  ;;  %v2252_v7 = vadd.f32 1e-05, %v459_v26 }
 0x14d   :  { %v1332_v6 = vpop.eup %1331  ;;  %v2259_v3 = vadd.f32 1e-05, %v460_v63  ;;  %v580_v35 = vmul.f32 %v1328_v29, %v579_v51 }
 0x14e   :  { %v566_v38 = vmul.f32 %v1332_v6, %v2235_v56  ;;  %1333 = vrsqrt.f32 %v2252_v7  ;;  %v590_v48 = vmul.f32 %v1330_v17, %v589_v32  ;;  %vm572_vm5 = vweird.f32 %v1332_v6 }
 0x14f   :  { %1335 = vrsqrt.f32 %v2259_v3  ;;  %v406_v20 = vpop.xlane.xlu2 %405  ;;  %v355_v21 = vpop.xlane.xlu0 %354  ;;  %v584_v25 = vsel %vm583_vm3, %v1328_v29, %v580_v35  ;;  %vm573_vm7 = vmor %vm571_vm6, %vm572_vm5  ;;  %vm551_vm10 = vweird.f32 %v2252_v7  ;;  %vm561_vm12 = vweird.f32 %v2259_v3 }
 0x150   :  { %v567_v22 = vmul.f32 %v1332_v6, %v566_v38  ;;  %v358_v47 = vpop.xlane.xlu1 %357  ;;  %v670_v60 = vmul.f32 %v654_v34, %v584_v25  ;;  %v594_v4 = vsel %vm593_vm4, %v1330_v17, %v590_v48  ;;  %v653_v17 = vld [vmem:[%s2936_s1 + $0x40] sm:$0xff] }
 0x151   :  { %v442_v23 = vadd.f32 %v406_v20, %v358_v47  ;;  %v671_v44 = vmul.f32 %v655_v43, %v594_v4 }
 0x152   :  { %v568_v26 = vmul.f32 0.5, %v567_v22  ;;  %742 = vperm.xlu1 %1315, %v670_v60  }
 0x153   :  { %v458_v51 = vmul.f32 0.001953125, %v442_v23  ;;  %752 = vperm.xlu2 %1316, %v672_v57   ;;  %747 = vperm.xlu0 %1314, %v671_v44  }
 0x154   :  { %v1334_v63 = vpop.eup %1333  ;;  %v569_v15 = vsub.f32 1.5, %v568_v26 }
 0x155   :  { %v1336_v32 = vpop.eup %1335  ;;  %v546_v29 = vmul.f32 %v1334_v63, %v2252_v7  ;;  %v474_v19 = vadd.f32 1e-05, %v458_v51  ;;  %vm552_vm8 = vweird.f32 %v1334_v63  ;;  %v652_v7 = vld [vmem:[%s2936_s1 + $0x38] sm:$0xff] }
 0x156   :  { %v556_v35 = vmul.f32 %v1336_v32, %v2259_v3  ;;  %v570_v34 = vmul.f32 %v1332_v6, %v569_v15  ;;  %vm562_vm9 = vweird.f32 %v1336_v32  ;;  %vm553_vm11 = vmor %vm551_vm10, %vm552_vm8 }
 0x157   :  { %v547_v38 = vmul.f32 %v1334_v63, %v546_v29  ;;  %1337 = vrsqrt.f32 %v474_v19  ;;  %v352_v20 = vpop.xlane.xlu2 %351  ;;  %v400_v18 = vpop.xlane.xlu0 %399  ;;  %vm563_vm13 = vmor %vm561_vm12, %vm562_vm9  ;;  %vm541_vm15 = vweird.f32 %v474_v19 }
 0x158   :  { %v557_v42 = vmul.f32 %v1336_v32, %v556_v35  ;;  %v403_v48 = vpop.xlane.xlu1 %402  ;;  %v440_v43 = vadd.f32 %v400_v18, %v352_v20  ;;  %v574_v25 = vsel %vm573_vm7, %v1332_v6, %v570_v34  ;;  %v651_v6 = vld [vmem:[%s2936_s1 + $0x30] sm:$0xff] }
 0x159   :  { %v548_v22 = vmul.f32 0.5, %v547_v38  ;;  %v441_v47 = vadd.f32 %v403_v48, %v355_v21  ;;  %v669_v60 = vmul.f32 %v653_v17, %v574_v25 }
 0x15a   :  { %v558_v56 = vmul.f32 0.5, %v557_v42  ;;  %v456_v23 = vmul.f32 0.001953125, %v440_v43 }
 0x15b   :  { %v549_v4 = vsub.f32 1.5, %v548_v22  ;;  %v457_v26 = vmul.f32 0.001953125, %v441_v47  ;;  %737 = vperm.xlu2 %1316, %v669_v60  }
 0x15c   :  { %v559_v57 = vsub.f32 1.5, %v558_v56  ;;  %v2285_v44 = vadd.f32 1e-05, %v456_v23 }
 0x15d   :  { %v1338_v51 = vpop.eup %1337  ;;  %v2288_v15 = vadd.f32 1e-05, %v457_v26  ;;  %v550_v29 = vmul.f32 %v1334_v63, %v549_v4 }
 0x15e   :  { %v536_v21 = vmul.f32 %v1338_v51, %v474_v19  ;;  %1339 = vrsqrt.f32 %v2285_v44  ;;  %v560_v17 = vmul.f32 %v1336_v32, %v559_v57  ;;  %vm542_vm14 = vweird.f32 %v1338_v51 }
 0x15f   :  { %1341 = vrsqrt.f32 %v2288_v15  ;;  %v397_v35 = vpop.xlane.xlu2 %396  ;;  %v346_v34 = vpop.xlane.xlu0 %345  ;;  %v554_v38 = vsel %vm553_vm11, %v1334_v63, %v550_v29  ;;  %vm543_vm0 = vmor %vm541_vm15, %vm542_vm14  ;;  %vm521_vm3 = vweird.f32 %v2285_v44  ;;  %vm531_vm5 = vweird.f32 %v2288_v15 }
 0x160   :  { %v537_v20 = vmul.f32 %v1338_v51, %v536_v21  ;;  %v349_v18 = vpop.xlane.xlu1 %348  ;;  %v667_v42 = vmul.f32 %v651_v6, %v554_v38  ;;  %v564_v43 = vsel %vm563_vm13, %v1336_v32, %v560_v17  ;;  %v650_v32 = vld [vmem:[%s2936_s1 + $0x28] sm:$0xff] }
 0x161   :  { %v439_v48 = vadd.f32 %v397_v35, %v349_v18  ;;  %v668_v22 = vmul.f32 %v652_v7, %v564_v43 }
 0x162   :  { %v538_v25 = vmul.f32 0.5, %v537_v20  ;;  %727 = vperm.xlu1 %1315, %v667_v42  }
 0x163   :  { %v455_v3 = vmul.f32 0.001953125, %v439_v48  ;;  %732 = vperm.xlu0 %1314, %v668_v22  }
 0x164   :  { %v1340_v47 = vpop.eup %1339  ;;  %v539_v60 = vsub.f32 1.5, %v538_v25 }
 0x165   :  { %v1342_v56 = vpop.eup %1341  ;;  %v516_v23 = vmul.f32 %v1340_v47, %v2285_v44  ;;  %v471_v4 = vadd.f32 1e-05, %v455_v3  ;;  %vm522_vm1 = vweird.f32 %v1340_v47 }
 0x166   :  { %v526_v63 = vmul.f32 %v1342_v56, %v2288_v15  ;;  %v540_v26 = vmul.f32 %v1338_v51, %v539_v60  ;;  %vm532_vm2 = vweird.f32 %v1342_v56  ;;  %vm523_vm4 = vmor %vm521_vm3, %vm522_vm1 }
 0x167   :  { %v517_v57 = vmul.f32 %v1340_v47, %v516_v23  ;;  %1343 = vrsqrt.f32 %v471_v4  ;;  %v343_v29 = vpop.xlane.xlu2 %342  ;;  %v391_v6 = vpop.xlane.xlu0 %390  ;;  %vm533_vm6 = vmor %vm531_vm5, %vm532_vm2  ;;  %vm511_vm8 = vweird.f32 %v471_v4 }
 0x168   :  { %v527_v21 = vmul.f32 %v1342_v56, %v526_v63  ;;  %v394_v35 = vpop.xlane.xlu1 %393  ;;  %v437_v17 = vadd.f32 %v391_v6, %v343_v29  ;;  %v544_v7 = vsel %vm543_vm0, %v1338_v51, %v540_v26  ;;  %v648_v51 = vld [vmem:[%s2936_s1 + $0x18] sm:$0xff]  ;;  %v649_v26 = vld [vmem:[%s2936_s1 + $0x20] sm:$0xff] }
 0x169   :  { %v518_v38 = vmul.f32 0.5, %v517_v57  ;;  %v438_v20 = vadd.f32 %v394_v35, %v346_v34  ;;  %v666_v18 = vmul.f32 %v650_v32, %v544_v7 }
 0x16a   :  { %v528_v19 = vmul.f32 0.5, %v527_v21  ;;  %v453_v42 = vmul.f32 0.001953125, %v437_v17 }
 0x16b   :  { %v519_v48 = vsub.f32 1.5, %v518_v38  ;;  %v454_v43 = vmul.f32 0.001953125, %v438_v20  ;;  %722 = vperm.xlu2 %1316, %v666_v18  }
 0x16c   :  { %v529_v25 = vsub.f32 1.5, %v528_v19  ;;  %v469_v22 = vadd.f32 1e-05, %v453_v42 }
 0x16d   :  { %v1344_v3 = vpop.eup %1343  ;;  %v470_v60 = vadd.f32 1e-05, %v454_v43  ;;  %v520_v23 = vmul.f32 %v1340_v47, %v519_v48 }
 0x16e   :  { %v506_v34 = vmul.f32 %v1344_v3, %v471_v4  ;;  %1345 = vrsqrt.f32 %v469_v22  ;;  %v530_v63 = vmul.f32 %v1342_v56, %v529_v25  ;;  %vm512_vm7 = vweird.f32 %v1344_v3 }
 0x16f   :  { %1347 = vrsqrt.f32 %v470_v60  ;;  %v524_v32 = vsel %vm523_vm4, %v1340_v47, %v520_v23  ;;  %v2313_v57 = vpop.permute.xlu2 %864  ;;  %v647_v47 = vld [vmem:[%s2936_s1 + $0x10] sm:$0xff]  ;;  %vm513_vm9 = vmor %vm511_vm8, %vm512_vm7  ;;  %vm491_vm12 = vweird.f32 %v469_v22  ;;  %vm501_vm13 = vweird.f32 %v470_v60 }
 0x170   :  { %v507_v44 = vmul.f32 %v1344_v3, %v506_v34  ;;  %v664_v29 = vmul.f32 %v648_v51, %v524_v32  ;;  %v534_v6 = vsel %vm533_vm6, %v1342_v56, %v530_v63  ;;  %v645_v63 = vld [vmem:[%s2936_s1] sm:$0xff] }
 0x171   :  { %v665_v35 = vmul.f32 %v649_v26, %v534_v6 }
 0x172   :  { %v508_v21 = vmul.f32 0.5, %v507_v44  ;;  %712 = vperm.xlu1 %1315, %v664_v29   ;;  %v677_v29 = vld [vmem:[%s2935_s2] sm:$0xff] }
 0x173   :  { %717 = vperm.xlu0 %1314, %v665_v35  }
 0x174   :  { %v1346_v17 = vpop.eup %1345  ;;  %v509_v7 = vsub.f32 1.5, %v508_v21 }
 0x175   :  { %v1348_v15 = vpop.eup %1347  ;;  %v486_v38 = vmul.f32 %v1346_v17, %v469_v22  ;;  %vm492_vm10 = vweird.f32 %v1346_v17 }
 0x176   :  { %v496_v20 = vmul.f32 %v1348_v15, %v470_v60  ;;  %v510_v18 = vmul.f32 %v1344_v3, %v509_v7  ;;  %vm502_vm11 = vweird.f32 %v1348_v15  ;;  %vm493_vm14 = vmor %vm491_vm12, %vm492_vm10  ;;  %v678_v7 = vld [vmem:[%s2935_s2 + $0x8] sm:$0xff] }
 0x177   :  { %v487_v19 = vmul.f32 %v1346_v17, %v486_v38  ;;  %v2318_v48 = vpop.permute.xlu2 %849  ;;  %vm503_vm15 = vmor %vm501_vm13, %vm502_vm11 }
 0x178   :  { %v497_v42 = vmul.f32 %v1348_v15, %v496_v20  ;;  %v514_v56 = vsel %vm513_vm9, %v1344_v3, %v510_v18  ;;  %v646_v3 = vld [vmem:[%s2936_s1 + $0x8] sm:$0xff] }
 0x179   :  { %v488_v43 = vmul.f32 0.5, %v487_v19  ;;  %v663_v25 = vmul.f32 %v647_v47, %v514_v56 }
 0x17a   :  { %v498_v23 = vmul.f32 0.5, %v497_v42 }
 0x17b   :  { %v489_v51 = vsub.f32 1.5, %v488_v43  ;;  %707 = vperm.xlu2 %1316, %v663_v25  }
 0x17c   :  { %v499_v34 = vsub.f32 1.5, %v498_v23 }
 0x17d   :  { %v490_v4 = vmul.f32 %v1346_v17, %v489_v51 }
 0x17e   :  { %v500_v26 = vmul.f32 %v1348_v15, %v499_v34 }
 0x17f   :  { %v494_v32 = vsel %vm493_vm14, %v1346_v17, %v490_v4  ;;  %v2329_v35 = vpop.permute.xlu2 %834 }
 0x180   :  { %v880_v44 = vpop.permute.xlu1 %879  ;;  %v504_v22 = vsel %vm503_vm15, %v1348_v15, %v500_v26  ;;  %v661_v6 = vmul.f32 %v645_v63, %v494_v32  ;;  %3104 = vst [vmem:[#allocation23_spill] sm:$0xff] %v2329_v35  ;;  %v885_v15 = vpop.permute.xlu0 %884  ;;  %v3107_v26 = vld [vmem:[#allocation31_spill] sm:$0xff]  ;;  %v3108_v32 = vld [vmem:[#allocation32_spill] sm:$0xff] }
 0x181   :  { %v662_v21 = vmul.f32 %v646_v3, %v504_v22  ;;  %v3109_v22 = vld [vmem:[#allocation29_spill] sm:$0xff] }
 0x182   :  { %697 = vperm.xlu1 %1315, %v661_v6  }
 0x183   :  { %809 = vperm.xlu2 %1316, %v677_v29   ;;  %702 = vperm.xlu0 %1314, %v662_v21   ;;  %v3110_v21 = vld [vmem:[#allocation30_spill] sm:$0xff] }
 0x187   :  { %v2334_v17 = vpop.permute.xlu2 %819 }
 0x188   :  { %v875_v60 = vpop.permute.xlu1 %874  ;;  %3105 = vst [vmem:[#allocation24_spill] sm:$0xff] %v2334_v17  ;;  %v2342_v56 = vpop.permute.xlu0 %859 }
 0x18b   :  { %814 = vperm.xlu0 %1314, %v678_v7  }
 0x190   :  { %v870_v38 = vpop.permute.xlu1 %869 }
 0x191   :  { %v2353_v17 = vpop.permute.xlu0 %844 }
 0x195   :  { %v768_v20 = vpop.permute.xlu2 %767 }
 0x196   :  { %v803_v25 = vmul.f32 %v768_v20, %v1835_v5  ;;  %v804_v51 = vmul.f32 %v768_v20, %v1838_v9  ;;  %v1092_v34 = vmul.f32 %v768_v20, %v1829_v11  ;;  %v1093_v4 = vmul.f32 %v768_v20, %v1832_v2 }
 0x198   :  { %v2336_v18 = vpop.permute.xlu1 %854  ;;  %v2355_v5 = vadd.f32 %v880_v44, %v803_v25 }
 0x19d   :  { %v763_v47 = vpop.permute.xlu2 %762 }
 0x19e   :  { %v801_v63 = vmul.f32 %v763_v47, %v1823_v12  ;;  %v1090_v11 = vmul.f32 %v763_v47, %v1841_v0  ;;  %v1091_v25 = vmul.f32 %v763_v47, %v1856_v14 }
 0x1a0   :  { %v2338_v19 = vpop.permute.xlu1 %839  ;;  %v2376_v0 = vadd.f32 %v875_v60, %v801_v63  ;;  %v2426_v63 = vpop.permute.xlu0 %829 }
 0x1a5   :  { %v758_v43 = vpop.permute.xlu2 %757 }
 0x1a6   :  { %v1089_v14 = vmul.f32 %v758_v43, %v1866_v46 }
 0x1a8   :  { %v2340_v42 = vpop.permute.xlu1 %824 }
 0x1a9   :  { %3106 = vst [vmem:[#allocation25_spill] sm:$0xff] %v2340_v42  ;;  %v3111_v42 = vld [vmem:[#allocation33_spill] sm:$0xff] }
 0x1aa   :  { %v802_v9 = vmul.f32 %v763_v47, %v3111_v42  ;;  %v799_v42 = vmul.f32 %v758_v43, %v1869_v61  ;;  %v2388_v47 = vadd.f32 %v1090_v11, %v875_v60 }
 0x1ac   :  { %3116 = vst [vmem:[#allocation33_spill] sm:$0xff] %v2388_v47 }
 0x1b0   :  { %v773_v23 = vpop.permute.xlu1 %772 }
 0x1b1   :  { %v805_v3 = vmul.f32 %v773_v23, %v3107_v26  ;;  %v806_v29 = vmul.f32 %v773_v23, %v3108_v32  ;;  %v1094_v6 = vmul.f32 %v773_v23, %v3109_v22  ;;  %v1095_v7 = vmul.f32 %v773_v23, %v3110_v21  ;;  %v753_v26 = vpop.permute.xlu2 %752 }
 0x1b2   :  { %v2367_v32 = vadd.f32 %v880_v44, %v804_v51  ;;  %v2369_v23 = vadd.f32 %v1092_v34, %v880_v44  ;;  %v2371_v22 = vadd.f32 %v1093_v4, %v880_v44  ;;  %v2382_v51 = vadd.f32 %v875_v60, %v802_v9 }
 0x1b3   :  { %v2359_v35 = vadd.f32 %v885_v15, %v805_v3  ;;  %v2361_v2 = vadd.f32 %v885_v15, %v806_v29  ;;  %v2363_v12 = vadd.f32 %v1094_v6, %v885_v15  ;;  %v2365_v20 = vadd.f32 %v1095_v7, %v885_v15 }
 0x1b4   :  { %3114 = vst [vmem:[#allocation29_spill] sm:$0xff] %v2369_v23  ;;  %v800_v15 = vmul.f32 %v758_v43, %v1872_v10  ;;  %v1088_v44 = vmul.f32 %v758_v43, %v1863_v53  ;;  %v797_v61 = vmul.f32 %v753_v26, %v1891_v39  ;;  %v798_v10 = vmul.f32 %v753_v26, %v1894_v62 }
 0x1b5   :  { %3112 = vst [vmem:[#allocation31_spill] sm:$0xff] %v2363_v12  ;;  %920 = vmatpush.msra.mxu0 %v2359_v35  ;;  %940 = vmatpush.msra.mxu1 %v2361_v2  ;;  %v2394_v34 = vadd.f32 %v1091_v25, %v875_v60  ;;  %v1086_v53 = vmul.f32 %v753_v26, %v1883_v58 }
 0x1b6   :  { %3113 = vst [vmem:[#allocation32_spill] sm:$0xff] %v2365_v20  ;;  %1128 = vmatpush.msra.mxu2 %v2363_v12  ;;  %1148 = vmatpush.msra.mxu3 %v2365_v20  ;;  %v1087_v46 = vmul.f32 %v753_v26, %v1886_v59  ;;  %v2400_v43 = vadd.f32 %v870_v38, %v799_v42  ;;  %v3142_v20 = vld [vmem:[#allocation17_spill] sm:$0xff] }
 0x1b7   :  { %3115 = vst [vmem:[#allocation30_spill] sm:$0xff] %v2371_v22  ;;  %921 = vmatpush.msra.mxu0 %v2355_v5  ;;  %941 = vmatpush.msra.mxu1 %v2367_v32  ;;  %v2402_v4 = vadd.f32 %v870_v38, %v800_v15  ;;  %v2406_v39 = vadd.f32 %v1088_v44, %v870_v38 }
 0x1b8   :  { %1129 = vmatpush.msra.mxu2 %v2369_v23  ;;  %1149 = vmatpush.msra.mxu3 %v2371_v22  ;;  %3117 = vst [vmem:[#allocation35_spill] sm:$0xff] %v2394_v34  ;;  %v2408_v62 = vadd.f32 %v1089_v14, %v870_v38  ;;  %v2413_v58 = vadd.f32 %v2313_v57, %v797_v61 }
 0x1b9   :  { %922 = vmatpush.msra.mxu0 %v2376_v0  ;;  %942 = vmatpush.msra.mxu1 %v2382_v51  ;;  %3118 = vst [vmem:[#allocation36_spill] sm:$0xff] %v2406_v39  ;;  %v2416_v59 = vadd.f32 %v2313_v57, %v798_v10  ;;  %v2421_v60 = vadd.f32 %v1086_v53, %v2313_v57  ;;  %v738_v29 = vpop.permute.xlu2 %737 }
 0x1ba   :  { %1130 = vmatpush.msra.mxu2 %v2388_v47  ;;  %1150 = vmatpush.msra.mxu3 %v2394_v34  ;;  %3119 = vst [vmem:[#allocation37_spill] sm:$0xff] %v2408_v62  ;;  %v2424_v38 = vadd.f32 %v1087_v46, %v2313_v57  ;;  %v791_v15 = vmul.f32 %v738_v29, %v1960_v1  ;;  %v3143_v34 = vld [vmem:[#allocation13_spill] sm:$0xff] }
 0x1bb   :  { %923 = vmatpush.msra.mxu0 %v2400_v43  ;;  %943 = vmatpush.msra.mxu1 %v2402_v4  ;;  %3120 = vst [vmem:[#allocation38_spill] sm:$0xff] %v2421_v60  ;;  %v792_v44 = vmul.f32 %v738_v29, %v1963_v52 }
 0x1bc   :  { %1131 = vmatpush.msra.mxu2 %v2406_v39  ;;  %1151 = vmatpush.msra.mxu3 %v2408_v62  ;;  %3121 = vst [vmem:[#allocation39_spill] sm:$0xff] %v2424_v38 }
 0x1bd   :  { %924 = vmatpush.msra.mxu0 %v2413_v58  ;;  %944 = vmatpush.msra.mxu1 %v2416_v59  ;;  %v2478_v52 = vadd.f32 %v2318_v48, %v792_v44  ;;  %v3132_v44 = vld [vmem:[#allocation23_spill] sm:$0xff] }
 0x1be   :  { %1132 = vmatpush.msra.mxu2 %v2421_v60  ;;  %1152 = vmatpush.msra.mxu3 %v2424_v38  ;;  %v3156_v38 = vld [vmem:[#allocation22_spill] sm:$0xff] }
 0x1c4   :  { %v743_v3 = vpop.permute.xlu1 %742 }
 0x1c5   :  { %v748_v6 = vpop.permute.xlu0 %747  ;;  %v793_v21 = vmul.f32 %v743_v3, %v1916_v36  ;;  %v794_v7 = vmul.f32 %v743_v3, %v1919_v30  ;;  %v1082_v25 = vmul.f32 %v743_v3, %v1923_v49  ;;  %v1083_v42 = vmul.f32 %v743_v3, %v1926_v50  ;;  %v723_v61 = vpop.permute.xlu2 %722 }
 0x1c6   :  { %v795_v57 = vmul.f32 %v748_v6, %v1901_v40  ;;  %v796_v9 = vmul.f32 %v748_v6, %v1904_v27  ;;  %v1084_v11 = vmul.f32 %v748_v6, %v1929_v24  ;;  %v1085_v26 = vmul.f32 %v748_v6, %v1932_v45 }
 0x1c7   :  { %v1080_v49 = vmul.f32 %v738_v29, %v1948_v54  ;;  %v1081_v50 = vmul.f32 %v738_v29, %v1951_v55  ;;  %v2459_v24 = vadd.f32 %v2336_v18, %v793_v21  ;;  %v2462_v45 = vadd.f32 %v2336_v18, %v794_v7 }
 0x1c8   :  { %v2443_v36 = vadd.f32 %v2342_v56, %v795_v57  ;;  %v2446_v30 = vadd.f32 %v2342_v56, %v796_v9  ;;  %v2449_v40 = vadd.f32 %v1084_v11, %v2342_v56  ;;  %v2452_v27 = vadd.f32 %v1085_v26, %v2342_v56  ;;  %v3126_v57 = vld [vmem:[#allocation9_spill] sm:$0xff]  ;;  %v3127_v11 = vld [vmem:[#allocation10_spill] sm:$0xff] }
 0x1c9   :  { %v2467_v1 = vadd.f32 %v1082_v25, %v2336_v18  ;;  %v2470_v54 = vadd.f32 %v1083_v42, %v2336_v18  ;;  %v2475_v55 = vadd.f32 %v2318_v48, %v791_v15  ;;  %v2483_v56 = vadd.f32 %v1080_v49, %v2318_v48 }
 0x1ca   :  { %3122 = vst [vmem:[#allocation40_spill] sm:$0xff] %v2449_v40  ;;  %925 = vmatpush.msra.mxu0 %v2443_v36  ;;  %945 = vmatpush.msra.mxu1 %v2446_v30  ;;  %v2486_v18 = vadd.f32 %v1081_v50, %v2318_v48  ;;  %v785_v9 = vmul.f32 %v723_v61, %v3126_v57 }
 0x1cb   :  { %3123 = vst [vmem:[#allocation41_spill] sm:$0xff] %v2452_v27  ;;  %1133 = vmatpush.msra.mxu2 %v2449_v40  ;;  %1153 = vmatpush.msra.mxu3 %v2452_v27  ;;  %v786_v26 = vmul.f32 %v723_v61, %v3127_v11 }
 0x1cc   :  { %3124 = vst [vmem:[#allocation42_spill] sm:$0xff] %v2470_v54  ;;  %926 = vmatpush.msra.mxu0 %v2459_v24  ;;  %946 = vmatpush.msra.mxu1 %v2462_v45  ;;  %v2535_v49 = vadd.f32 %v3132_v44, %v785_v9  ;;  %v3138_v9 = vld [vmem:[#allocation18_spill] sm:$0xff] }
 0x1cd   :  { %1134 = vmatpush.msra.mxu2 %v2467_v1  ;;  %1154 = vmatpush.msra.mxu3 %v2470_v54  ;;  %3125 = vst [vmem:[#allocation43_spill] sm:$0xff] %v2486_v18  ;;  %v2538_v50 = vadd.f32 %v3132_v44, %v786_v26  ;;  %v3139_v26 = vld [vmem:[#allocation19_spill] sm:$0xff] }
 0x1ce   :  { %927 = vmatpush.msra.mxu0 %v2475_v55  ;;  %947 = vmatpush.msra.mxu1 %v2478_v52 }
 0x1cf   :  { %1135 = vmatpush.msra.mxu2 %v2483_v56  ;;  %1155 = vmatpush.msra.mxu3 %v2486_v18  ;;  %v3157_v18 = vld [vmem:[#allocation6_spill] sm:$0xff] }
 0x1d4   :  { %v728_v14 = vpop.permute.xlu1 %727 }
 0x1d5   :  { %v733_v10 = vpop.permute.xlu0 %732  ;;  %v787_v53 = vmul.f32 %v728_v14, %v1979_v37  ;;  %v788_v46 = vmul.f32 %v728_v14, %v1982_v31  ;;  %v1076_v21 = vmul.f32 %v728_v14, %v1986_v8  ;;  %v1077_v7 = vmul.f32 %v728_v14, %v1989_v33 }
 0x1d6   :  { %v789_v3 = vmul.f32 %v733_v10, %v1954_v28  ;;  %v790_v48 = vmul.f32 %v733_v10, %v1957_v41  ;;  %v1078_v29 = vmul.f32 %v733_v10, %v1992_v16  ;;  %v1079_v6 = vmul.f32 %v733_v10, %v1995_v13  ;;  %v3129_v16 = vld [vmem:[#allocation34_spill] sm:$0xff]  ;;  %v3130_v13 = vld [vmem:[#allocation15_spill] sm:$0xff]  ;;  %v708_v10 = vpop.permute.xlu2 %707 }
 0x1d7   :  { %v1074_v8 = vmul.f32 %v723_v61, %v3129_v16  ;;  %v1075_v33 = vmul.f32 %v723_v61, %v3130_v13  ;;  %v2519_v25 = vadd.f32 %v2338_v19, %v787_v53  ;;  %v2522_v42 = vadd.f32 %v2338_v19, %v788_v46  ;;  %v3134_v46 = vld [vmem:[#allocation26_spill] sm:$0xff] }
 0x1d8   :  { %v2503_v37 = vadd.f32 %v2353_v17, %v789_v3  ;;  %v2506_v31 = vadd.f32 %v2353_v17, %v790_v48  ;;  %v2509_v28 = vadd.f32 %v1078_v29, %v2353_v17  ;;  %v2512_v41 = vadd.f32 %v1079_v6, %v2353_v17  ;;  %v3135_v48 = vld [vmem:[#allocation11_spill] sm:$0xff] }
 0x1d9   :  { %v2527_v17 = vadd.f32 %v1076_v21, %v2338_v19  ;;  %v2530_v15 = vadd.f32 %v1077_v7, %v2338_v19  ;;  %v2543_v14 = vadd.f32 %v1074_v8, %v3132_v44  ;;  %v2546_v19 = vadd.f32 %v1075_v33, %v3132_v44  ;;  %v3136_v6 = vld [vmem:[#allocation3_spill] sm:$0xff]  ;;  %v3137_v7 = vld [vmem:[#allocation4_spill] sm:$0xff] }
 0x1da   :  { %3128 = vst [vmem:[#allocation9_spill] sm:$0xff] %v2512_v41  ;;  %928 = vmatpush.msra.mxu0 %v2503_v37  ;;  %948 = vmatpush.msra.mxu1 %v2506_v31  ;;  %v3140_v8 = vld [vmem:[#allocation12_spill] sm:$0xff]  ;;  %v779_v22 = vmul.f32 %v708_v10, %v3142_v20  ;;  %v780_v62 = vmul.f32 %v708_v10, %v3143_v34  ;;  %v3147_v20 = vld [vmem:[#allocation25_spill] sm:$0xff] }
 0x1db   :  { %1136 = vmatpush.msra.mxu2 %v2509_v28  ;;  %1156 = vmatpush.msra.mxu3 %v2512_v41  ;;  %3131 = vst [vmem:[#allocation10_spill] sm:$0xff] %v2530_v15  ;;  %v3141_v33 = vld [vmem:[#allocation28_spill] sm:$0xff] }
 0x1dc   :  { %929 = vmatpush.msra.mxu0 %v2519_v25  ;;  %949 = vmatpush.msra.mxu1 %v2522_v42  ;;  %3133 = vst [vmem:[#allocation34_spill] sm:$0xff] %v2546_v19 }
 0x1dd   :  { %1137 = vmatpush.msra.mxu2 %v2527_v17  ;;  %1157 = vmatpush.msra.mxu3 %v2530_v15  ;;  %v3158_v15 = vld [vmem:[#allocation7_spill] sm:$0xff] }
 0x1de   :  { %930 = vmatpush.msra.mxu0 %v2535_v49  ;;  %950 = vmatpush.msra.mxu1 %v2538_v50 }
 0x1df   :  { %1138 = vmatpush.msra.mxu2 %v2543_v14  ;;  %1158 = vmatpush.msra.mxu3 %v2546_v19 }
 0x1e4   :  { %v713_v61 = vpop.permute.xlu1 %712 }
 0x1e5   :  { %v718_v53 = vpop.permute.xlu0 %717  ;;  %v781_v3 = vmul.f32 %v713_v61, %v3134_v46  ;;  %v782_v29 = vmul.f32 %v713_v61, %v3135_v48  ;;  %v1070_v13 = vmul.f32 %v713_v61, %v3140_v8  ;;  %v1071_v44 = vmul.f32 %v713_v61, %v3141_v33  ;;  %v3151_v8 = vld [vmem:[#allocation14_spill] sm:$0xff]  ;;  %v3152_v33 = vld [vmem:[#allocation5_spill] sm:$0xff] }
 0x1e6   :  { %v783_v21 = vmul.f32 %v718_v53, %v3136_v6  ;;  %v784_v57 = vmul.f32 %v718_v53, %v3137_v7  ;;  %v1072_v11 = vmul.f32 %v718_v53, %v3138_v9  ;;  %v1073_v16 = vmul.f32 %v718_v53, %v3139_v26  ;;  %v3145_v53 = vld [vmem:[#allocation20_spill] sm:$0xff]  ;;  %v3146_v26 = vld [vmem:[#allocation21_spill] sm:$0xff] }
 0x1e7   :  { %v1068_v9 = vmul.f32 %v708_v10, %v3145_v53  ;;  %v1069_v61 = vmul.f32 %v708_v10, %v3146_v26  ;;  %v2579_v34 = vadd.f32 %v3147_v20, %v781_v3  ;;  %v3149_v10 = vld [vmem:[#allocation24_spill] sm:$0xff]  ;;  %v3153_v53 = vld [vmem:[#allocation27_spill] sm:$0xff] }
 0x1e8   :  { %v2563_v46 = vadd.f32 %v2426_v63, %v783_v21  ;;  %v2566_v48 = vadd.f32 %v2426_v63, %v784_v57  ;;  %v2569_v6 = vadd.f32 %v1072_v11, %v2426_v63  ;;  %v2572_v7 = vadd.f32 %v1073_v16, %v2426_v63  ;;  %v3154_v26 = vld [vmem:[#allocation16_spill] sm:$0xff] }
 0x1e9   :  { %v2582_v21 = vadd.f32 %v3147_v20, %v782_v29  ;;  %v2587_v63 = vadd.f32 %v1070_v13, %v3147_v20  ;;  %v2590_v57 = vadd.f32 %v1071_v44, %v3147_v20  ;;  %v2595_v3 = vadd.f32 %v3149_v10, %v779_v22 }
 0x1ea   :  { %3144 = vst [vmem:[#allocation15_spill] sm:$0xff] %v2572_v7  ;;  %931 = vmatpush.msra.mxu0 %v2563_v46  ;;  %951 = vmatpush.msra.mxu1 %v2566_v48  ;;  %v2598_v29 = vadd.f32 %v3149_v10, %v780_v62  ;;  %v2603_v11 = vadd.f32 %v1068_v9, %v3149_v10 }
 0x1eb   :  { %1139 = vmatpush.msra.mxu2 %v2569_v6  ;;  %1159 = vmatpush.msra.mxu3 %v2572_v7  ;;  %3148 = vst [vmem:[#allocation23_spill] sm:$0xff] %v2590_v57  ;;  %v2606_v16 = vadd.f32 %v1069_v61, %v3149_v10  ;;  %v3155_v61 = vld [vmem:[#allocation8_spill] sm:$0xff] }
 0x1ec   :  { %932 = vmatpush.msra.mxu0 %v2579_v34  ;;  %952 = vmatpush.msra.mxu1 %v2582_v21 }
 0x1ed   :  { %1140 = vmatpush.msra.mxu2 %v2587_v63  ;;  %1160 = vmatpush.msra.mxu3 %v2590_v57  ;;  %3150 = vst [vmem:[#allocation26_spill] sm:$0xff] %v2606_v16 }
 0x1ee   :  { %933 = vmatpush.msra.mxu0 %v2595_v3  ;;  %953 = vmatpush.msra.mxu1 %v2598_v29 }
 0x1ef   :  { %1141 = vmatpush.msra.mxu2 %v2603_v11  ;;  %1161 = vmatpush.msra.mxu3 %v2606_v16 }
 0x1f4   :  { %v698_v62 = vpop.permute.xlu1 %697 }
 0x1f5   :  { %v703_v22 = vpop.permute.xlu0 %702  ;;  %v775_v13 = vmul.f32 %v698_v62, %v3151_v8  ;;  %v776_v44 = vmul.f32 %v698_v62, %v3152_v33  ;;  %v1064_v41 = vmul.f32 %v698_v62, %v3157_v18  ;;  %v1065_v19 = vmul.f32 %v698_v62, %v3158_v15 }
 0x1f6   :  { %v777_v9 = vmul.f32 %v703_v22, %v3153_v53  ;;  %v778_v20 = vmul.f32 %v703_v22, %v3154_v26  ;;  %v1066_v10 = vmul.f32 %v703_v22, %v3155_v61  ;;  %v1067_v27 = vmul.f32 %v703_v22, %v3156_v38  ;;  %v810_v53 = vpop.permute.xlu2 %809 }
 0x1f7   :  { %v2630_v26 = vadd.f32 %v810_v53, %v775_v13  ;;  %v2632_v38 = vadd.f32 %v810_v53, %v776_v44  ;;  %v2636_v18 = vadd.f32 %v1064_v41, %v810_v53  ;;  %v2638_v15 = vadd.f32 %v1065_v19, %v810_v53 }
 0x1f9   :  { %3160 = vst [vmem:[#allocation3_spill] sm:$0xff] %v2638_v15 }
 0x1fd   :  { %v815_v54 = vpop.permute.xlu0 %814 }
 0x1fe   :  { %v2620_v7 = vadd.f32 %v815_v54, %v777_v9  ;;  %v2622_v57 = vadd.f32 %v815_v54, %v778_v20  ;;  %v2624_v8 = vadd.f32 %v1066_v10, %v815_v54  ;;  %v2626_v33 = vadd.f32 %v1067_v27, %v815_v54  ;;  %v693_v27 = vld [vmem:[%s2937_s3] sm:$0x1] }
 0x1ff   :  { %v919_v54 = vstv %s2938_s4 }
 0x200   :  { %3159 = vst [vmem:[#allocation11_spill] sm:$0xff] %v2626_v33  ;;  %934 = vmatpush.msra.mxu0 %v2620_v7  ;;  %954 = vmatpush.msra.mxu1 %v2622_v57 }
 0x201   :  { %1142 = vmatpush.msra.mxu2 %v2624_v8  ;;  %1162 = vmatpush.msra.mxu3 %v2626_v33 }
 0x202   :  { %935 = vmatpush.msra.mxu0 %v2630_v26  ;;  %955 = vmatpush.msra.mxu1 %v2632_v38 }
 0x203   :  { %1143 = vmatpush.msra.mxu2 %v2636_v18  ;;  %1163 = vmatpush.msra.mxu3 %v2638_v15 }
 0x204   :  { %936 = vmatmul.f32.vlgmr.msra.gmra.mxu0 %v693_v27  ;;  %956 = vmatmul.f32.vlgmr.msra.gmra.mxu1 %v693_v27 }
 0x205   :  { %1144 = vmatmul.f32.vlgmr.msra.gmra.mxu2 %v693_v27  ;;  %1164 = vmatmul.f32.vlgmr.msra.gmra.mxu3 %v693_v27 }
 0x281   :  { %v937_v41 = vpop.f32.mrf.mxu0  ;;  %v957_v19 = vpop.f32.mrf.mxu1 }
 0x282   :  { %v938_v22 = vadd.f32 %v937_v41, %v919_v54  ;;  %v958_v62 = vadd.f32 %v957_v19, %v919_v54 }
 0x284   :  { %v1277_v13 = vmul.f32 -1.442695, %v938_v22  ;;  %v1278_v44 = vmul.f32 -1.442695, %v958_v62 }
 0x286   :  { %1349 = vpow2.f32 %v1277_v13 }
 0x287   :  { %1351 = vpow2.f32 %v1278_v44 }
 0x288   :  { %v1145_v9 = vpop.f32.mrf.mxu2  ;;  %v1165_v12 = vpop.f32.mrf.mxu3 }
 0x289   :  { %v1146_v20 = vadd.f32 %v1145_v9, %v919_v54  ;;  %v1166_v62 = vadd.f32 %v1165_v12, %v919_v54 }
 0x28b   :  { %v1279_v61 = vmul.f32 -1.442695, %v1146_v20 }
 0x28c   :  { %v1350_v10 = vpop.eup %1349 }
 0x28d   :  { %v1352_v53 = vpop.eup %1351  ;;  %v966_v16 = vadd.f32 1.0, %v1350_v10  ;;  %1353 = vpow2.f32 %v1279_v61  ;;  %v1280_v61 = vmul.f32 -1.442695, %v1166_v62 }
 0x28e   :  { %v967_v33 = vadd.f32 1.0, %v1352_v53 }
 0x28f   :  { %1355 = vrcp.f32 %v966_v16  ;;  %vm973_vm0 = vweird.f32 %v966_v16  ;;  %v979_v13 = vand.u32 2147483648, %v966_v16  ;;  %v977_v20 = vand.u32 2147483647, %v966_v16 }
 0x290   :  { %1357 = vrcp.f32 %v967_v33  ;;  %vm988_vm4 = vweird.f32 %v967_v33  ;;  %v994_v62 = vand.u32 2147483648, %v967_v33 }
 0x291   :  { %v980_v47 = vor.u32 1.1754944e-38, %v979_v13  ;;  %vm978_vm3 = vcmp.eq.f32.partialorder %v977_v20, 8.507059e+37 }
 0x293   :  { %v1354_v27 = vpop.eup %1353 }
 0x294   :  { %v2650_v44 = vadd.f32 1.0, %v1354_v27 }
 0x295   :  { %v1356_v15 = vpop.eup %1355 }
 0x296   :  { %v1358_v23 = vpop.eup %1357  ;;  %v969_v41 = vmul.f32 %v1356_v15, %v966_v16  ;;  %vm974_vm1 = vweird.f32 %v1356_v15  ;;  %1359 = vrcp.f32 %v2650_v44  ;;  %vm1181_vm9 = vweird.f32 %v2650_v44 }
 0x297   :  { %v984_v19 = vmul.f32 %v1358_v23, %v967_v33  ;;  %vm975_vm2 = vmor %vm973_vm0, %vm974_vm1  ;;  %1361 = vpow2.f32 %v1280_v61  ;;  %vm989_vm5 = vweird.f32 %v1358_v23 }
 0x298   :  { %v970_v22 = vsub.f32 1.0, %v969_v41  ;;  %vm990_vm6 = vmor %vm988_vm4, %vm989_vm5 }
 0x299   :  { %v985_v10 = vsub.f32 1.0, %v984_v19 }
 0x29a   :  { %v971_v9 = vmul.f32 %v1356_v15, %v970_v22 }
 0x29b   :  { %v986_v60 = vmul.f32 %v1358_v23, %v985_v10 }
 0x29c   :  { %v972_v53 = vadd.f32 %v1356_v15, %v971_v9  ;;  %v2656_v19 = vpop.eup %1359 }
 0x29d   :  { %v987_v27 = vadd.f32 %v1358_v23, %v986_v60  ;;  %v1362_v60 = vpop.eup %1361  ;;  %vm1182_vm8 = vweird.f32 %v2656_v19 }
 0x29e   :  { %v976_v39 = vsel %vm975_vm2, %v1356_v15, %v972_v53  ;;  %vm1183_vm10 = vmor %vm1181_vm9, %vm1182_vm8 }
 0x29f   :  { %v981_v40 = vsel %vm978_vm3, %v980_v47, %v976_v39  ;;  %v992_v47 = vand.u32 2147483647, %v967_v33 }
 0x2a0   :  { %v998_v41 = vperm.slane %v981_v40, 0 }
 0x2a1   :  { %vm993_vm7 = vcmp.eq.f32.partialorder %v992_v47, 8.507059e+37 }
 0x2a2   :  { %v1000_v12 = vmul.f32 %v998_v41, %v2630_v26  ;;  %v1002_v54 = vmul.f32 %v998_v41, %v2620_v7  ;;  %v1004_v16 = vmul.f32 %v998_v41, %v2595_v3  ;;  %v1006_v22 = vmul.f32 %v998_v41, %v2579_v34 }
 0x2a3   :  { %v1008_v15 = vmul.f32 %v998_v41, %v2563_v46  ;;  %v1010_v39 = vmul.f32 %v998_v41, %v2535_v49  ;;  %v1012_v40 = vmul.f32 %v998_v41, %v2519_v25  ;;  %v991_v46 = vsel %vm990_vm6, %v1358_v23, %v987_v27 }
 0x2a4   :  { %1032 = vst [vmem:[%s2939_s5] sm:$0xff] %v1000_v12  ;;  %v1177_v7 = vmul.f32 %v2656_v19, %v2650_v44  ;;  %v1014_v34 = vmul.f32 %v998_v41, %v2503_v37  ;;  %v995_v49 = vor.u32 1.1754944e-38, %v994_v62  ;;  %v1016_v3 = vmul.f32 %v998_v41, %v2475_v55 }
 0x2a5   :  { %1034 = vst [vmem:[%s2939_s5 + $0x10] sm:$0xff] %v1002_v54  ;;  %v1018_v25 = vmul.f32 %v998_v41, %v2459_v24  ;;  %v2685_v37 = vadd.f32 1.0, %v1362_v60  ;;  %v1020_v33 = vmul.f32 %v998_v41, %v2443_v36  ;;  %v1022_v26 = vmul.f32 %v998_v41, %v2413_v58 }
 0x2a6   :  { %1036 = vst [vmem:[%s2939_s5 + $0x20] sm:$0xff] %v1004_v16  ;;  %v996_v23 = vsel %vm993_vm7, %v995_v49, %v991_v46  ;;  %v1178_v55 = vsub.f32 1.0, %v1177_v7  ;;  %v1024_v24 = vmul.f32 %v998_v41, %v2400_v43  ;;  %v1026_v36 = vmul.f32 %v998_v41, %v2376_v0  ;;  %v3162_v46 = vld [vmem:[#allocation38_spill] sm:$0xff]  ;;  %v3163_v7 = vld [vmem:[#allocation36_spill] sm:$0xff]  ;;  %v3164_v49 = vld [vmem:[#allocation33_spill] sm:$0xff] }
 0x2a7   :  { %1038 = vst [vmem:[%s2939_s5 + $0x30] sm:$0xff] %v1006_v22  ;;  %v999_v13 = vperm.slane %v996_v23, 0  ;;  %1363 = vrcp.f32 %v2685_v37  ;;  %v1028_v58 = vmul.f32 %v998_v41, %v2355_v5  ;;  %v1030_v9 = vmul.f32 %v998_v41, %v2359_v35 }
 0x2a8   :  { %1040 = vst [vmem:[%s2939_s5 + $0x40] sm:$0xff] %v1008_v15  ;;  %v1179_v43 = vmul.f32 %v2656_v19, %v1178_v55  ;;  %v1202_v62 = vand.u32 2147483648, %v2685_v37  ;;  %vm1196_vm13 = vweird.f32 %v2685_v37  ;;  %v3167_v55 = vld [vmem:[#allocation3_spill] sm:$0xff] }
 0x2a9   :  { %1042 = vst [vmem:[%s2939_s5 + $0x50] sm:$0xff] %v1010_v39  ;;  %v1001_v0 = vmul.f32 %v999_v13, %v2632_v38  ;;  %v1003_v5 = vmul.f32 %v999_v13, %v2622_v57  ;;  %v1005_v35 = vmul.f32 %v999_v13, %v2598_v29  ;;  %v1007_v38 = vmul.f32 %v999_v13, %v2582_v21 }
 0x2aa   :  { %1044 = vst [vmem:[%s2939_s5 + $0x60] sm:$0xff] %v1012_v40  ;;  %v1180_v20 = vadd.f32 %v2656_v19, %v1179_v43  ;;  %v1187_v57 = vand.u32 2147483648, %v2650_v44  ;;  %v1009_v53 = vmul.f32 %v999_v13, %v2566_v48  ;;  %v1185_v29 = vand.u32 2147483647, %v2650_v44  ;;  %v3170_v43 = vld [vmem:[#allocation23_spill] sm:$0xff] }
 0x2ab   :  { %1046 = vst [vmem:[%s2939_s5 + $0x70] sm:$0xff] %v1014_v34  ;;  %v1011_v61 = vmul.f32 %v999_v13, %v2538_v50  ;;  %v1013_v21 = vmul.f32 %v999_v13, %v2522_v42  ;;  %v1015_v44 = vmul.f32 %v999_v13, %v2506_v31  ;;  %v1017_v12 = vmul.f32 %v999_v13, %v2478_v52 }
 0x2ac   :  { %1048 = vst [vmem:[%s2939_s5 + $0x80] sm:$0xff] %v1016_v3  ;;  %v1184_v48 = vsel %vm1183_vm10, %v2656_v19, %v1180_v20  ;;  %v1188_v50 = vor.u32 1.1754944e-38, %v1187_v57  ;;  %vm1186_vm11 = vcmp.eq.f32.partialorder %v1185_v29, 8.507059e+37  ;;  %v1019_v42 = vmul.f32 %v999_v13, %v2462_v45  ;;  %v3174_v57 = vld [vmem:[#allocation9_spill] sm:$0xff]  ;;  %v3175_v29 = vld [vmem:[#allocation43_spill] sm:$0xff] }
 0x2ad   :  { %1050 = vst [vmem:[%s2939_s5 + $0x90] sm:$0xff] %v1018_v25  ;;  %v2727_v10 = vpop.eup %1363  ;;  %v1021_v31 = vmul.f32 %v999_v13, %v2446_v30  ;;  %v1023_v52 = vmul.f32 %v999_v13, %v2416_v59  ;;  %v1025_v45 = vmul.f32 %v999_v13, %v2402_v4  ;;  %v1027_v30 = vmul.f32 %v999_v13, %v2382_v51  ;;  %v3165_v25 = vld [vmem:[#allocation29_spill] sm:$0xff] }
 0x2ae   :  { %1052 = vst [vmem:[%s2939_s5 + $0xa0] sm:$0xff] %v1020_v33  ;;  %v1192_v41 = vmul.f32 %v2727_v10, %v2685_v37  ;;  %v1189_v54 = vsel %vm1186_vm11, %v1188_v50, %v1184_v48  ;;  %v1029_v19 = vmul.f32 %v999_v13, %v2367_v32  ;;  %v1031_v4 = vmul.f32 %v999_v13, %v2361_v2  ;;  %v3178_v50 = vld [vmem:[#allocation39_spill] sm:$0xff] }
 0x2af   :  { %1054 = vst [vmem:[%s2939_s5 + $0xb0] sm:$0xff] %v1022_v26  ;;  %v1206_v27 = vperm.slane %v1189_v54, 0  ;;  %vm1197_vm12 = vweird.f32 %v2727_v10 }
 0x2b0   :  { %1056 = vst [vmem:[%s2939_s5 + $0xc0] sm:$0xff] %v1024_v24  ;;  %v1193_v16 = vsub.f32 1.0, %v1192_v41  ;;  %vm1198_vm14 = vmor %vm1196_vm13, %vm1197_vm12  ;;  %v3168_v24 = vld [vmem:[#allocation11_spill] sm:$0xff]  ;;  %v3177_v41 = vld [vmem:[#allocation41_spill] sm:$0xff] }
 0x2b1   :  { %1058 = vst [vmem:[%s2939_s5 + $0xd0] sm:$0xff] %v1026_v36  ;;  %v1208_v51 = vmul.f32 %v1206_v27, %v2636_v18  ;;  %v1210_v32 = vmul.f32 %v1206_v27, %v2624_v8  ;;  %v1212_v2 = vmul.f32 %v1206_v27, %v2603_v11  ;;  %v1214_v18 = vmul.f32 %v1206_v27, %v2587_v63  ;;  %v3169_v36 = vld [vmem:[#allocation26_spill] sm:$0xff] }
 0x2b2   :  { %1060 = vst [vmem:[%s2939_s5 + $0xe0] sm:$0xff] %v1028_v58  ;;  %v1194_v59 = vmul.f32 %v2727_v10, %v1193_v16  ;;  %v1216_v8 = vmul.f32 %v1206_v27, %v2569_v6  ;;  %v1200_v11 = vand.u32 2147483647, %v2685_v37  ;;  %v1218_v15 = vmul.f32 %v1206_v27, %v2543_v14  ;;  %v3166_v37 = vld [vmem:[#allocation31_spill] sm:$0xff] }
 0x2b3   :  { %1062 = vst [vmem:[%s2939_s5 + $0xf0] sm:$0xff] %v1030_v9  ;;  %v1220_v63 = vmul.f32 %v1206_v27, %v2527_v17  ;;  %v1222_v47 = vmul.f32 %v1206_v27, %v2509_v28  ;;  %v1203_v14 = vor.u32 1.1754944e-38, %v1202_v62  ;;  %v1224_v39 = vmul.f32 %v1206_v27, %v2483_v56  ;;  %v3161_v28 = vld [vmem:[#allocation40_spill] sm:$0xff] }
 0x2b4   :  { %1033 = vst [vmem:[%s2939_s5 + $0x8] sm:$0xff] %v1001_v0  ;;  %v1195_v22 = vadd.f32 %v2727_v10, %v1194_v59  ;;  %vm1201_vm15 = vcmp.eq.f32.partialorder %v1200_v11, 8.507059e+37  ;;  %v1226_v17 = vmul.f32 %v1206_v27, %v2467_v1  ;;  %v1228_v40 = vmul.f32 %v1206_v27, %v3161_v28  ;;  %v3171_v0 = vld [vmem:[#allocation15_spill] sm:$0xff] }
 0x2b5   :  { %1035 = vst [vmem:[%s2939_s5 + $0x18] sm:$0xff] %v1003_v5  ;;  %v1230_v56 = vmul.f32 %v1206_v27, %v3162_v46  ;;  %v1232_v34 = vmul.f32 %v1206_v27, %v3163_v7  ;;  %v1234_v3 = vmul.f32 %v1206_v27, %v3164_v49  ;;  %v1236_v23 = vmul.f32 %v1206_v27, %v3165_v25 }
 0x2b6   :  { %1037 = vst [vmem:[%s2939_s5 + $0x28] sm:$0xff] %v1005_v35  ;;  %v1199_v6 = vsel %vm1198_vm14, %v2727_v10, %v1195_v22  ;;  %v1238_v33 = vmul.f32 %v1206_v27, %v3166_v37  ;;  %v3172_v35 = vld [vmem:[#allocation34_spill] sm:$0xff]  ;;  %v3182_v27 = vld [vmem:[#allocation32_spill] sm:$0xff] }
 0x2b7   :  { %1039 = vst [vmem:[%s2939_s5 + $0x38] sm:$0xff] %v1007_v38  ;;  %v1204_v60 = vsel %vm1201_vm15, %v1203_v14, %v1199_v6  ;;  %v3173_v10 = vld [vmem:[#allocation10_spill] sm:$0xff] }
 0x2b8   :  { %1041 = vst [vmem:[%s2939_s5 + $0x48] sm:$0xff] %v1009_v53  ;;  %v1207_v1 = vperm.slane %v1204_v60, 0 }
 0x2b9   :  { %1043 = vst [vmem:[%s2939_s5 + $0x58] sm:$0xff] %v1011_v61 }
 0x2ba   :  { %1045 = vst [vmem:[%s2939_s5 + $0x68] sm:$0xff] %v1013_v21  ;;  %v1209_v26 = vmul.f32 %v1207_v1, %v3167_v55  ;;  %v1211_v13 = vmul.f32 %v1207_v1, %v3168_v24  ;;  %v1213_v58 = vmul.f32 %v1207_v1, %v3169_v36  ;;  %v1215_v9 = vmul.f32 %v1207_v1, %v3170_v43  ;;  %v3176_v21 = vld [vmem:[#allocation42_spill] sm:$0xff] }
 0x2bb   :  { %1047 = vst [vmem:[%s2939_s5 + $0x78] sm:$0xff] %v1015_v44  ;;  %v1217_v5 = vmul.f32 %v1207_v1, %v3171_v0  ;;  %v1219_v20 = vmul.f32 %v1207_v1, %v3172_v35  ;;  %v1221_v38 = vmul.f32 %v1207_v1, %v3173_v10  ;;  %v1223_v53 = vmul.f32 %v1207_v1, %v3174_v57 }
 0x2bc   :  { %1049 = vst [vmem:[%s2939_s5 + $0x88] sm:$0xff] %v1017_v12  ;;  %v1225_v61 = vmul.f32 %v1207_v1, %v3175_v29  ;;  %v1227_v48 = vmul.f32 %v1207_v1, %v3176_v21  ;;  %v1229_v44 = vmul.f32 %v1207_v1, %v3177_v41  ;;  %v1231_v12 = vmul.f32 %v1207_v1, %v3178_v50 }
 0x2bd   :  { %1051 = vst [vmem:[%s2939_s5 + $0x98] sm:$0xff] %v1019_v42  ;;  %v3179_v42 = vld [vmem:[#allocation37_spill] sm:$0xff] }
 0x2be   :  { %1053 = vst [vmem:[%s2939_s5 + $0xa8] sm:$0xff] %v1021_v31  ;;  %v1233_v54 = vmul.f32 %v1207_v1, %v3179_v42  ;;  %v3180_v31 = vld [vmem:[#allocation35_spill] sm:$0xff] }
 0x2bf   :  { %1055 = vst [vmem:[%s2939_s5 + $0xb8] sm:$0xff] %v1023_v52  ;;  %v1235_v16 = vmul.f32 %v1207_v1, %v3180_v31  ;;  %v3181_v52 = vld [vmem:[#allocation30_spill] sm:$0xff] }
 0x2c0   :  { %1057 = vst [vmem:[%s2939_s5 + $0xc8] sm:$0xff] %v1025_v45  ;;  %v1237_v45 = vmul.f32 %v1207_v1, %v3181_v52 }
 0x2c1   :  { %1059 = vst [vmem:[%s2939_s5 + $0xd8] sm:$0xff] %v1027_v30  ;;  %v1239_v30 = vmul.f32 %v1207_v1, %v3182_v27 }
 0x2c2   :  { %1061 = vst [vmem:[%s2939_s5 + $0xe8] sm:$0xff] %v1029_v19 }
 0x2c3   :  { %1063 = vst [vmem:[%s2939_s5 + $0xf8] sm:$0xff] %v1031_v4 }
 0x2c4   :  { %1281 = vst [vmem:[%s2939_s5 + $0x100] sm:$0xff] %v1208_v51 }
 0x2c5   :  { %1283 = vst [vmem:[%s2939_s5 + $0x110] sm:$0xff] %v1210_v32 }
 0x2c6   :  { %1285 = vst [vmem:[%s2939_s5 + $0x120] sm:$0xff] %v1212_v2 }
 0x2c7   :  { %1287 = vst [vmem:[%s2939_s5 + $0x130] sm:$0xff] %v1214_v18 }
 0x2c8   :  { %1289 = vst [vmem:[%s2939_s5 + $0x140] sm:$0xff] %v1216_v8 }
 0x2c9   :  { %1291 = vst [vmem:[%s2939_s5 + $0x150] sm:$0xff] %v1218_v15 }
 0x2ca   :  { %1293 = vst [vmem:[%s2939_s5 + $0x160] sm:$0xff] %v1220_v63 }
 0x2cb   :  { %1295 = vst [vmem:[%s2939_s5 + $0x170] sm:$0xff] %v1222_v47 }
 0x2cc   :  { %1297 = vst [vmem:[%s2939_s5 + $0x180] sm:$0xff] %v1224_v39 }
 0x2cd   :  { %1299 = vst [vmem:[%s2939_s5 + $0x190] sm:$0xff] %v1226_v17 }
 0x2ce   :  { %1301 = vst [vmem:[%s2939_s5 + $0x1a0] sm:$0xff] %v1228_v40 }
 0x2cf   :  { %1303 = vst [vmem:[%s2939_s5 + $0x1b0] sm:$0xff] %v1230_v56 }
 0x2d0   :  { %1305 = vst [vmem:[%s2939_s5 + $0x1c0] sm:$0xff] %v1232_v34 }
 0x2d1   :  { %1307 = vst [vmem:[%s2939_s5 + $0x1d0] sm:$0xff] %v1234_v3 }
 0x2d2   :  { %1309 = vst [vmem:[%s2939_s5 + $0x1e0] sm:$0xff] %v1236_v23 }
 0x2d3   :  { %1311 = vst [vmem:[%s2939_s5 + $0x1f0] sm:$0xff] %v1238_v33 }
 0x2d4   :  { %1282 = vst [vmem:[%s2939_s5 + $0x108] sm:$0xff] %v1209_v26 }
 0x2d5   :  { %1284 = vst [vmem:[%s2939_s5 + $0x118] sm:$0xff] %v1211_v13 }
 0x2d6   :  { %1286 = vst [vmem:[%s2939_s5 + $0x128] sm:$0xff] %v1213_v58 }
 0x2d7   :  { %1288 = vst [vmem:[%s2939_s5 + $0x138] sm:$0xff] %v1215_v9 }
 0x2d8   :  { %1290 = vst [vmem:[%s2939_s5 + $0x148] sm:$0xff] %v1217_v5 }
 0x2d9   :  { %1292 = vst [vmem:[%s2939_s5 + $0x158] sm:$0xff] %v1219_v20 }
 0x2da   :  { %1294 = vst [vmem:[%s2939_s5 + $0x168] sm:$0xff] %v1221_v38 }
 0x2db   :  { %1296 = vst [vmem:[%s2939_s5 + $0x178] sm:$0xff] %v1223_v53 }
 0x2dc   :  { %1298 = vst [vmem:[%s2939_s5 + $0x188] sm:$0xff] %v1225_v61 }
 0x2dd   :  { %1300 = vst [vmem:[%s2939_s5 + $0x198] sm:$0xff] %v1227_v48 }
 0x2de   :  { %1302 = vst [vmem:[%s2939_s5 + $0x1a8] sm:$0xff] %v1229_v44 }
 0x2df   :  { %1304 = vst [vmem:[%s2939_s5 + $0x1b8] sm:$0xff] %v1231_v12 }
 0x2e0   :  { %1306 = vst [vmem:[%s2939_s5 + $0x1c8] sm:$0xff] %v1233_v54 }
 0x2e1   :  { %1308 = vst [vmem:[%s2939_s5 + $0x1d8] sm:$0xff] %v1235_v16 }
 0x2e2   :  { %1310 = vst [vmem:[%s2939_s5 + $0x1e8] sm:$0xff] %v1237_v45 }
 0x2e3   :  { %1312 = vst [vmem:[%s2939_s5 + $0x1f8] sm:$0xff] %v1239_v30 }

</bundles_post_ra>
